<compile_context>
chip_gen: v7x
topology: tpu7x:2x2x1
jax: 0.10.0
libtpu: 0.0.40
codegen_flags: <defaults>
</compile_context>

<pallas_src>
import functools

import jax
import jax.numpy as jnp
from jax.experimental import pallas as pl
from jax.experimental.pallas import tpu as pltpu


def _class_attn_kernel(x_ref, wq_ref, wkv_ref, wp_ref, bp_ref, m_ref, mt_ref,
                       o_ref, *, fuse_kv):
    # x_ref:   (TB, N, C)   activations (already in the matmul compute dtype)
    # wq_ref:  (C, C)       Wq^T * scale (scale folded in on the host)
    # wkv_ref: (C, 2C) if fuse_kv else (2, C, C)   [Wk^T | Wv^T]
    # wp_ref:  (C, 2C)      Wproj^T
    # bp_ref:  (1, 2C)      f32 bias
    # m_ref:   (C, H)       f32 head-membership matrix (channel -> head)
    # mt_ref:  (H, C)       its transpose (head -> channel broadcast)
    # o_ref:   (TB, 2C)     lane-dense output block
    TB, N, C = x_ref.shape
    H = m_ref.shape[-1]

    x = x_ref[...]                                   # (TB, N, C)
    xk = x.reshape(TB * N, C)                        # free view when N % pack == 0

    # --- K / V projection (MXU, f32 accumulate) ------------------------------
    if fuse_kv:
        kv = jnp.dot(xk, wkv_ref[...], preferred_element_type=jnp.float32)
        k = kv[:, :C]                                # lane-aligned (C % 128 == 0)
        v = kv[:, C:]
    else:
        wkv = wkv_ref[...]                           # (2, C, C)
        k = jnp.dot(xk, wkv[0], preferred_element_type=jnp.float32)
        v = jnp.dot(xk, wkv[1], preferred_element_type=jnp.float32)

    # --- Q only for the cls token (row 0) of each batch row -------------------
    x_cls = x[:, 0, :]                               # (TB, C)
    q = jnp.dot(x_cls, wq_ref[...], preferred_element_type=jnp.float32)  # (TB, C) f32

    # --- per-head scores: contract q*k over each head's channels via M (MXU) --
    qk = k.reshape(TB, N, C) * q[:, None, :]         # (TB, N, C)  VPU, f32
    scores = jnp.dot(qk.reshape(TB * N, C), m_ref[...],
                     preferred_element_type=jnp.float32)             # (TB*N, H)
    scores = scores.reshape(TB, N, H)

    # --- softmax over keys, per batch row & head (per-segment max: NaN-safe) --
    mx = scores.max(axis=1, keepdims=True)           # (TB, 1, H)  XLU sublane reduce
    e = jnp.exp(scores - mx)                         # (TB, N, H)  EUP, f32
    s = e.sum(axis=1)                                # (TB, H)     XLU sublane reduce
    inv = pl.reciprocal(s, approx=True)              # s >= 1, so approx recip is safe

    # --- attention-weighted value sum ------------------------------------------
    e_exp = jnp.dot(e.reshape(TB * N, H), mt_ref[...],
                    preferred_element_type=jnp.float32)              # (TB*N, C)
    ctx_un = (e_exp * v).reshape(TB, N, C).sum(axis=1)               # (TB, C)  XLU
    inv_c = jnp.dot(inv, mt_ref[...], preferred_element_type=jnp.float32)  # (TB, C)
    ctx = ctx_un * inv_c                                             # fold 1/denominator

    # --- output projection -------------------------------------------------------
    y = jnp.dot(ctx.astype(wp_ref.dtype), wp_ref[...],
                preferred_element_type=jnp.float32) + bp_ref[...]
    o_ref[...] = y.astype(o_ref.dtype)               # (TB, 2C) lane-dense store


def _pick_tb(B, N, block_b):
    """Largest divisor of B that is <= block_b and keeps >= 2 grid steps."""
    if block_b is None:
        # Target >= 256 MXU M-rows (v6e/v7x pass width; also >= 128 for v5e).
        block_b = max(1, pl.cdiv(256, N))
    cap = min(block_b, B)
    for tb in range(cap, 0, -1):
        if B % tb == 0 and B // tb >= 2:     # >= 2 steps -> both v7x TCs get work
            return tb
    return B                                  # B == 1: single grid step


def _vmem_budget_bytes(TB, N, C, H, in_itemsize, out_itemsize):
    x_block = TB * N * C * in_itemsize                     # double-buffered
    out_block = TB * 2 * C * out_itemsize                  # double-buffered
    consts = 5 * C * C * in_itemsize + 2 * C * 4 + 2 * C * H * 4
    live_f32 = 6 * TB * N * C * 4 + 4 * TB * N * H * 4     # kv/k/v/e_exp/qk + scores/e
    est = 2 * x_block + 2 * out_block + 2 * consts + live_f32 + (1 << 20)
    # Raise the default scoped limit when large TB blocks need it, but stay
    # inside v7x's 64 MiB physical VMEM.
    return int(min(max(est, 16 << 20), 48 << 20))


def class_attention(x, wq, wk, wv, wp, bp, num_heads=8, block_b=None,
                    compute_dtype=None):
    """x: (B, N, C); wq/wk/wv: (C, C) torch layout (out, in); wp: (2C, C); bp: (2C,).

    compute_dtype: dtype used for MXU operand feeds (e.g. jnp.bfloat16 for
    production C >= 384).  Accumulation and elementwise math stay in f32.
    """
    B, N, C = x.shape
    H = num_heads
    head_dim = C // H
    scale = head_dim ** (-0.5)
    out_dtype = x.dtype
    compute_dtype = jnp.dtype(compute_dtype) if compute_dtype is not None else jnp.dtype(x.dtype)

    TB = _pick_tb(B, N, block_b)
    fuse_kv = (C % 128 == 0)      # only rely on the fused split when lane-aligned

    # --- host-side constant prep (hoisted out of the kernel) --------------------
    wq_t = (wq.T * scale).astype(compute_dtype)                       # scale folded in
    if fuse_kv:
        wkv = jnp.concatenate([wk.T, wv.T], axis=1).astype(compute_dtype)   # (C, 2C)
        wkv_shape = (C, 2 * C)
    else:
        wkv = jnp.stack([wk.T, wv.T], axis=0).astype(compute_dtype)         # (2, C, C)
        wkv_shape = (2, C, C)
    wp_t = wp.T.astype(compute_dtype)                                 # (C, 2C)
    bp2 = bp.reshape(1, -1).astype(jnp.float32)                       # (1, 2C)
    M = (jnp.arange(C)[:, None] // head_dim
         == jnp.arange(H)[None, :]).astype(jnp.float32)               # (C, H)
    MT = M.T                                                          # (H, C)
    # Casting x in the wrapper halves its HBM->VMEM DMA traffic when bf16.
    # NOTE: the in-kernel (TB,N,C)->(TB*N,C) reshape is only a free view when
    # N is a multiple of the sublane packing (8 for f32, 16 for bf16).
    x_c = x.astype(compute_dtype)

    kernel = functools.partial(_class_attn_kernel, fuse_kv=fuse_kv)
    vmem_limit = _vmem_budget_bytes(TB, N, C, H, compute_dtype.itemsize,
                                    jnp.dtype(out_dtype).itemsize)

    def _call(single_buffer_consts):
        # Constant-index-map blocks never change across grid steps -> 1 buffer.
        const_kw = {"pipeline_mode": pl.Buffered(1)} if single_buffer_consts else {}

        def const_spec(shape):
            nd = len(shape)
            return pl.BlockSpec(shape, lambda b, _nd=nd: (0,) * _nd, **const_kw)

        grid_spec = pltpu.PrefetchScalarGridSpec(
            num_scalar_prefetch=0,
            grid=(B // TB,),
            in_specs=[
                pl.BlockSpec((TB, N, C), lambda b: (b, 0, 0)),   # x (TB batch rows)
                const_spec((C, C)),                              # Wq^T * scale
                const_spec(wkv_shape),                           # K/V weight
                const_spec((C, 2 * C)),                          # Wproj^T
                const_spec((1, 2 * C)),                          # bproj
                const_spec((C, H)),                              # M
                const_spec((H, C)),                              # M^T
            ],
            out_specs=pl.BlockSpec((TB, 2 * C), lambda b: (b, 0)),
        )
        return pl.pallas_call(
            kernel,
            out_shape=jax.ShapeDtypeStruct((B, 2 * C), out_dtype),
            grid_spec=grid_spec,
            compiler_params=pltpu.CompilerParams(
                dimension_semantics=("parallel",),
                vmem_limit_bytes=vmem_limit),
        )(x_c, wq_t, wkv, wp_t, bp2, M, MT)

    try:
        out2d = _call(True)
    except Exception:
        # Fallback for runtimes that reject single-buffered (Buffered(1)) specs.
        out2d = _call(False)

    return out2d.reshape(B, 1, 2 * C)


def class_attention_ref(x, wq, wk, wv, wp, bp, num_heads=8):
    """Pure-JAX reference mirroring the PyTorch forward exactly."""
    B, N, C = x.shape
    hd = C // num_heads
    scale = hd ** (-0.5)
    q = (x[:, 0] @ wq.T).reshape(B, 1, num_heads, hd).transpose(0, 2, 1, 3)
    k = (x @ wk.T).reshape(B, N, num_heads, hd).transpose(0, 2, 1, 3)
    v = (x @ wv.T).reshape(B, N, num_heads, hd).transpose(0, 2, 1, 3)
    q = q * scale
    attn = jnp.einsum("bhqd,bhkd->bhqk", q, k)
    attn = jax.nn.softmax(attn, axis=-1)
    x_cls = jnp.einsum("bhqk,bhkd->bhqd", attn, v).transpose(0, 2, 1, 3).reshape(B, 1, C)
    return x_cls @ wp.T + bp


if __name__ == "__main__":
    B, N, C = 16, 16, 32         # N multiple of 16 -> free reshape for f32 and bf16
    num_heads = 8

    key = jax.random.PRNGKey(0)
    kx, kq, kk, kv, kp, kb = jax.random.split(key, 6)

    x = jax.random.normal(kx, (B, N, C), dtype=jnp.float32)
    wq = 0.05 * jax.random.normal(kq, (C, C), dtype=jnp.float32)       # Linear(dim, dim), no bias
    wk = 0.05 * jax.random.normal(kk, (C, C), dtype=jnp.float32)
    wv = 0.05 * jax.random.normal(kv, (C, C), dtype=jnp.float32)
    wp = 0.05 * jax.random.normal(kp, (2 * C, C), dtype=jnp.float32)   # Linear(dim, 2*dim)
    bp = 0.05 * jax.random.normal(kb, (2 * C,), dtype=jnp.float32)

    ref = class_attention_ref(x, wq, wk, wv, wp, bp, num_heads=num_heads)

    # f32 path (tight correctness check).
    out = class_attention(x, wq, wk, wv, wp, bp, num_heads=num_heads)
    out = jax.block_until_ready(out)
    assert out.shape == (B, 1, 2 * C)
    assert jnp.allclose(out, ref, atol=1e-3, rtol=1e-3), "f32 mismatch vs reference"

    # bf16 MXU-operand path (production setting: halves x DMA traffic, native
    # bf16 MXU rate; f32 accumulate + f32 elementwise kept inside the kernel).
    out_bf16 = class_attention(x, wq, wk, wv, wp, bp, num_heads=num_heads,
                               compute_dtype=jnp.bfloat16)
    out_bf16 = jax.block_until_ready(out_bf16)
    assert jnp.allclose(out_bf16, ref, atol=5e-2, rtol=5e-2), "bf16 mismatch vs reference"

    print("KERNEL_OK")
</pallas_src>

<mosaic_0001>
module attributes {stable_mosaic.version = 11 : i64} {
  func.func @_class_attn_kernel(%arg0: i32, %arg1: memref<8x16x32xf32, #tpu.memory_space<vmem>>, %arg2: memref<32x32xf32, #tpu.memory_space<vmem>>, %arg3: memref<2x32x32xf32, #tpu.memory_space<vmem>>, %arg4: memref<32x64xf32, #tpu.memory_space<vmem>>, %arg5: memref<1x64xf32, #tpu.memory_space<vmem>>, %arg6: memref<32x8xf32, #tpu.memory_space<vmem>>, %arg7: memref<8x32xf32, #tpu.memory_space<vmem>>, %arg8: memref<8x64xf32, #tpu.memory_space<vmem>>) attributes {dimension_semantics = [#tpu.dimension_semantics<parallel>], iteration_bounds = array<i64: 2>, scalar_prefetch = 0 : i64, scratch_operands = 0 : i64, tpu.core_type = #tpu.core_type<tc>, window_params = [{transform_indices = @transform_0, window_bounds = array<i64: 8, 16, 32>}, {pipeline_mode = #tpu.pipeline_mode<synchronous>, transform_indices = @transform_1, window_bounds = array<i64: 32, 32>}, {pipeline_mode = #tpu.pipeline_mode<synchronous>, transform_indices = @transform_2, window_bounds = array<i64: 2, 32, 32>}, {pipeline_mode = #tpu.pipeline_mode<synchronous>, transform_indices = @transform_3, window_bounds = array<i64: 32, 64>}, {pipeline_mode = #tpu.pipeline_mode<synchronous>, transform_indices = @transform_4, window_bounds = array<i64: 1, 64>}, {pipeline_mode = #tpu.pipeline_mode<synchronous>, transform_indices = @transform_5, window_bounds = array<i64: 32, 8>}, {pipeline_mode = #tpu.pipeline_mode<synchronous>, transform_indices = @transform_6, window_bounds = array<i64: 8, 32>}, {transform_indices = @transform_7, window_bounds = array<i64: 8, 64>}]} {
    %c0 = arith.constant 0 : index
    %c0_0 = arith.constant 0 : index
    %c0_1 = arith.constant 0 : index
    %0 = vector.load %arg1[%c0, %c0_0, %c0_1] : memref<8x16x32xf32, #tpu.memory_space<vmem>>, vector<8x16x32xf32>
    %1 = vector.shape_cast %0 : vector<8x16x32xf32> to vector<128x32xf32>
    %c0_2 = arith.constant 0 : index
    %c0_3 = arith.constant 0 : index
    %c0_4 = arith.constant 0 : index
    %2 = vector.load %arg3[%c0_2, %c0_3, %c0_4] : memref<2x32x32xf32, #tpu.memory_space<vmem>>, vector<2x32x32xf32>
    %3 = vector.extract_strided_slice %2 {offsets = [0, 0, 0], sizes = [1, 32, 32], strides = [1, 1, 1]} : vector<2x32x32xf32> to vector<1x32x32xf32>
    %4 = vector.shape_cast %3 : vector<1x32x32xf32> to vector<32x32xf32>
    %cst = arith.constant dense<0.000000e+00> : vector<128x32xf32>
    %5 = tpu.matmul %1, %4, %cst {dimension_numbers = #tpu.dot_dimension_numbers<[1], [0], [0], [1], [0, 0, 1, 1], [], []>} : vector<128x32xf32>, vector<32x32xf32>, vector<128x32xf32> -> vector<128x32xf32>
    %6 = vector.extract_strided_slice %2 {offsets = [1, 0, 0], sizes = [1, 32, 32], strides = [1, 1, 1]} : vector<2x32x32xf32> to vector<1x32x32xf32>
    %7 = vector.shape_cast %6 : vector<1x32x32xf32> to vector<32x32xf32>
    %cst_5 = arith.constant dense<0.000000e+00> : vector<128x32xf32>
    %8 = tpu.matmul %1, %7, %cst_5 {dimension_numbers = #tpu.dot_dimension_numbers<[1], [0], [0], [1], [0, 0, 1, 1], [], []>} : vector<128x32xf32>, vector<32x32xf32>, vector<128x32xf32> -> vector<128x32xf32>
    %9 = vector.extract_strided_slice %0 {offsets = [0, 0, 0], sizes = [8, 1, 32], strides = [1, 1, 1]} : vector<8x16x32xf32> to vector<8x1x32xf32>
    %10 = vector.shape_cast %9 : vector<8x1x32xf32> to vector<8x32xf32>
    %c0_6 = arith.constant 0 : index
    %c0_7 = arith.constant 0 : index
    %11 = vector.load %arg2[%c0_6, %c0_7] : memref<32x32xf32, #tpu.memory_space<vmem>>, vector<32x32xf32>
    %cst_8 = arith.constant dense<0.000000e+00> : vector<8x32xf32>
    %12 = tpu.matmul %10, %11, %cst_8 {dimension_numbers = #tpu.dot_dimension_numbers<[1], [0], [0], [1], [0, 0, 1, 1], [], []>} : vector<8x32xf32>, vector<32x32xf32>, vector<8x32xf32> -> vector<8x32xf32>
    %13 = vector.shape_cast %5 : vector<128x32xf32> to vector<8x16x32xf32>
    %14 = vector.shape_cast %12 : vector<8x32xf32> to vector<8x1x32xf32>
    %15 = vector.broadcast %14 : vector<8x1x32xf32> to vector<8x16x32xf32>
    %16 = arith.mulf %13, %15 : vector<8x16x32xf32>
    %17 = vector.shape_cast %16 : vector<8x16x32xf32> to vector<128x32xf32>
    %c0_9 = arith.constant 0 : index
    %c0_10 = arith.constant 0 : index
    %18 = vector.load %arg6[%c0_9, %c0_10] : memref<32x8xf32, #tpu.memory_space<vmem>>, vector<32x8xf32>
    %cst_11 = arith.constant dense<0.000000e+00> : vector<128x8xf32>
    %19 = tpu.matmul %17, %18, %cst_11 {dimension_numbers = #tpu.dot_dimension_numbers<[1], [0], [0], [1], [0, 0, 1, 1], [], []>} : vector<128x32xf32>, vector<32x8xf32>, vector<128x8xf32> -> vector<128x8xf32>
    %20 = vector.shape_cast %19 : vector<128x8xf32> to vector<8x16x8xf32>
    %cst_12 = arith.constant dense<0xFF800000> : vector<8x8xf32>
    %21 = vector.multi_reduction <maximumf>, %20, %cst_12 [1] : vector<8x16x8xf32> to vector<8x8xf32>
    %22 = vector.shape_cast %21 : vector<8x8xf32> to vector<8x1x8xf32>
    %23 = vector.broadcast %22 : vector<8x1x8xf32> to vector<8x16x8xf32>
    %24 = arith.subf %20, %23 : vector<8x16x8xf32>
    %25 = math.exp %24 : vector<8x16x8xf32>
    %cst_13 = arith.constant dense<0.000000e+00> : vector<8x8xf32>
    %26 = vector.multi_reduction <add>, %25, %cst_13 [1] : vector<8x16x8xf32> to vector<8x8xf32>
    %27 = tpu.reciprocal %26 {approx = true} : vector<8x8xf32> -> vector<8x8xf32>
    %28 = vector.shape_cast %25 : vector<8x16x8xf32> to vector<128x8xf32>
    %c0_14 = arith.constant 0 : index
    %c0_15 = arith.constant 0 : index
    %29 = vector.load %arg7[%c0_14, %c0_15] : memref<8x32xf32, #tpu.memory_space<vmem>>, vector<8x32xf32>
    %cst_16 = arith.constant dense<0.000000e+00> : vector<128x32xf32>
    %30 = tpu.matmul %28, %29, %cst_16 {dimension_numbers = #tpu.dot_dimension_numbers<[1], [0], [0], [1], [0, 0, 1, 1], [], []>} : vector<128x8xf32>, vector<8x32xf32>, vector<128x32xf32> -> vector<128x32xf32>
    %31 = arith.mulf %30, %8 : vector<128x32xf32>
    %32 = vector.shape_cast %31 : vector<128x32xf32> to vector<8x16x32xf32>
    %cst_17 = arith.constant dense<0.000000e+00> : vector<8x32xf32>
    %33 = vector.multi_reduction <add>, %32, %cst_17 [1] : vector<8x16x32xf32> to vector<8x32xf32>
    %c0_18 = arith.constant 0 : index
    %c0_19 = arith.constant 0 : index
    %34 = vector.load %arg7[%c0_18, %c0_19] : memref<8x32xf32, #tpu.memory_space<vmem>>, vector<8x32xf32>
    %cst_20 = arith.constant dense<0.000000e+00> : vector<8x32xf32>
    %35 = tpu.matmul %27, %34, %cst_20 {dimension_numbers = #tpu.dot_dimension_numbers<[1], [0], [0], [1], [0, 0, 1, 1], [], []>} : vector<8x8xf32>, vector<8x32xf32>, vector<8x32xf32> -> vector<8x32xf32>
    %36 = arith.mulf %33, %35 : vector<8x32xf32>
    %c0_21 = arith.constant 0 : index
    %c0_22 = arith.constant 0 : index
    %37 = vector.load %arg4[%c0_21, %c0_22] : memref<32x64xf32, #tpu.memory_space<vmem>>, vector<32x64xf32>
    %cst_23 = arith.constant dense<0.000000e+00> : vector<8x64xf32>
    %38 = tpu.matmul %36, %37, %cst_23 {dimension_numbers = #tpu.dot_dimension_numbers<[1], [0], [0], [1], [0, 0, 1, 1], [], []>} : vector<8x32xf32>, vector<32x64xf32>, vector<8x64xf32> -> vector<8x64xf32>
    %c0_24 = arith.constant 0 : index
    %c0_25 = arith.constant 0 : index
    %39 = vector.load %arg5[%c0_24, %c0_25] : memref<1x64xf32, #tpu.memory_space<vmem>>, vector<1x64xf32>
    %40 = vector.broadcast %39 : vector<1x64xf32> to vector<8x64xf32>
    %41 = arith.addf %38, %40 : vector<8x64xf32>
    %c0_26 = arith.constant 0 : index
    %c0_27 = arith.constant 0 : index
    %42 = vector.load %arg8[%c0_26, %c0_27] : memref<8x64xf32, #tpu.memory_space<vmem>>, vector<8x64xf32>
    tpu.vector_store %arg8[%c0_26, %c0_27], %41 {strides = array<i32>} : memref<8x64xf32, #tpu.memory_space<vmem>>, vector<8x64xf32>,
    return
  }
  func.func @transform_0(%arg0: i32) -> (i32, i32, i32) {
    %c0_i32 = arith.constant 0 : i32
    %c0_i32_0 = arith.constant 0 : i32
    %c0_i32_1 = arith.constant 0 : i32
    return %arg0, %c0_i32, %c0_i32_0 : i32, i32, i32
  }
  func.func @transform_1(%arg0: i32) -> (i32, i32) {
    %c0_i32 = arith.constant 0 : i32
    %c0_i32_0 = arith.constant 0 : i32
    %c0_i32_1 = arith.constant 0 : i32
    return %c0_i32, %c0_i32_0 : i32, i32
  }
  func.func @transform_2(%arg0: i32) -> (i32, i32, i32) {
    %c0_i32 = arith.constant 0 : i32
    %c0_i32_0 = arith.constant 0 : i32
    %c0_i32_1 = arith.constant 0 : i32
    %c0_i32_2 = arith.constant 0 : i32
    return %c0_i32, %c0_i32_0, %c0_i32_1 : i32, i32, i32
  }
  func.func @transform_3(%arg0: i32) -> (i32, i32) {
    %c0_i32 = arith.constant 0 : i32
    %c0_i32_0 = arith.constant 0 : i32
    %c0_i32_1 = arith.constant 0 : i32
    return %c0_i32, %c0_i32_0 : i32, i32
  }
  func.func @transform_4(%arg0: i32) -> (i32, i32) {
    %c0_i32 = arith.constant 0 : i32
    %c0_i32_0 = arith.constant 0 : i32
    %c0_i32_1 = arith.constant 0 : i32
    return %c0_i32, %c0_i32_0 : i32, i32
  }
  func.func @transform_5(%arg0: i32) -> (i32, i32) {
    %c0_i32 = arith.constant 0 : i32
    %c0_i32_0 = arith.constant 0 : i32
    %c0_i32_1 = arith.constant 0 : i32
    return %c0_i32, %c0_i32_0 : i32, i32
  }
  func.func @transform_6(%arg0: i32) -> (i32, i32) {
    %c0_i32 = arith.constant 0 : i32
    %c0_i32_0 = arith.constant 0 : i32
    %c0_i32_1 = arith.constant 0 : i32
    return %c0_i32, %c0_i32_0 : i32, i32
  }
  func.func @transform_7(%arg0: i32) -> (i32, i32) {
    %c0_i32 = arith.constant 0 : i32
    %c0_i32_0 = arith.constant 0 : i32
    return %arg0, %c0_i32 : i32, i32
  }
}

module attributes {stable_mosaic.version = 11 : i64} {
  func.func @_class_attn_kernel(%arg0: i32, %arg1: memref<8x16x32xf32, #tpu.memory_space<vmem>>, %arg2: memref<32x32xf32, #tpu.memory_space<vmem>>, %arg3: memref<2x32x32xf32, #tpu.memory_space<vmem>>, %arg4: memref<32x64xf32, #tpu.memory_space<vmem>>, %arg5: memref<1x64xf32, #tpu.memory_space<vmem>>, %arg6: memref<32x8xf32, #tpu.memory_space<vmem>>, %arg7: memref<8x32xf32, #tpu.memory_space<vmem>>, %arg8: memref<8x64xf32, #tpu.memory_space<vmem>>) attributes {dimension_semantics = [#tpu.dimension_semantics<parallel>], iteration_bounds = array<i64: 2>, scalar_prefetch = 0 : i64, scratch_operands = 0 : i64, tpu.core_type = #tpu.core_type<tc>, window_params = [{transform_indices = @transform_0, window_bounds = array<i64: 8, 16, 32>}, {pipeline_mode = #tpu.pipeline_mode<synchronous>, transform_indices = @transform_1, window_bounds = array<i64: 32, 32>}, {pipeline_mode = #tpu.pipeline_mode<synchronous>, transform_indices = @transform_2, window_bounds = array<i64: 2, 32, 32>}, {pipeline_mode = #tpu.pipeline_mode<synchronous>, transform_indices = @transform_3, window_bounds = array<i64: 32, 64>}, {pipeline_mode = #tpu.pipeline_mode<synchronous>, transform_indices = @transform_4, window_bounds = array<i64: 1, 64>}, {pipeline_mode = #tpu.pipeline_mode<synchronous>, transform_indices = @transform_5, window_bounds = array<i64: 32, 8>}, {pipeline_mode = #tpu.pipeline_mode<synchronous>, transform_indices = @transform_6, window_bounds = array<i64: 8, 32>}, {transform_indices = @transform_7, window_bounds = array<i64: 8, 64>}]} {
    %c0 = arith.constant 0 : index
    %c0_0 = arith.constant 0 : index
    %c0_1 = arith.constant 0 : index
    %0 = vector.load %arg1[%c0, %c0_0, %c0_1] : memref<8x16x32xf32, #tpu.memory_space<vmem>>, vector<8x16x32xf32>
    %1 = vector.shape_cast %0 : vector<8x16x32xf32> to vector<128x32xf32>
    %c0_2 = arith.constant 0 : index
    %c0_3 = arith.constant 0 : index
    %c0_4 = arith.constant 0 : index
    %2 = vector.load %arg3[%c0_2, %c0_3, %c0_4] : memref<2x32x32xf32, #tpu.memory_space<vmem>>, vector<2x32x32xf32>
    %3 = vector.extract_strided_slice %2 {offsets = [0, 0, 0], sizes = [1, 32, 32], strides = [1, 1, 1]} : vector<2x32x32xf32> to vector<1x32x32xf32>
    %4 = vector.shape_cast %3 : vector<1x32x32xf32> to vector<32x32xf32>
    %cst = arith.constant dense<0.000000e+00> : vector<128x32xf32>
    %5 = tpu.matmul %1, %4, %cst {dimension_numbers = #tpu.dot_dimension_numbers<[1], [0], [0], [1], [0, 0, 1, 1], [], []>} : vector<128x32xf32>, vector<32x32xf32>, vector<128x32xf32> -> vector<128x32xf32>
    %6 = vector.extract_strided_slice %2 {offsets = [1, 0, 0], sizes = [1, 32, 32], strides = [1, 1, 1]} : vector<2x32x32xf32> to vector<1x32x32xf32>
    %7 = vector.shape_cast %6 : vector<1x32x32xf32> to vector<32x32xf32>
    %cst_5 = arith.constant dense<0.000000e+00> : vector<128x32xf32>
    %8 = tpu.matmul %1, %7, %cst_5 {dimension_numbers = #tpu.dot_dimension_numbers<[1], [0], [0], [1], [0, 0, 1, 1], [], []>} : vector<128x32xf32>, vector<32x32xf32>, vector<128x32xf32> -> vector<128x32xf32>
    %9 = vector.extract_strided_slice %0 {offsets = [0, 0, 0], sizes = [8, 1, 32], strides = [1, 1, 1]} : vector<8x16x32xf32> to vector<8x1x32xf32>
    %10 = vector.shape_cast %9 : vector<8x1x32xf32> to vector<8x32xf32>
    %c0_6 = arith.constant 0 : index
    %c0_7 = arith.constant 0 : index
    %11 = vector.load %arg2[%c0_6, %c0_7] : memref<32x32xf32, #tpu.memory_space<vmem>>, vector<32x32xf32>
    %cst_8 = arith.constant dense<0.000000e+00> : vector<8x32xf32>
    %12 = tpu.matmul %10, %11, %cst_8 {dimension_numbers = #tpu.dot_dimension_numbers<[1], [0], [0], [1], [0, 0, 1, 1], [], []>} : vector<8x32xf32>, vector<32x32xf32>, vector<8x32xf32> -> vector<8x32xf32>
    %13 = vector.shape_cast %5 : vector<128x32xf32> to vector<8x16x32xf32>
    %14 = vector.shape_cast %12 : vector<8x32xf32> to vector<8x1x32xf32>
    %15 = vector.broadcast %14 : vector<8x1x32xf32> to vector<8x16x32xf32>
    %16 = arith.mulf %13, %15 : vector<8x16x32xf32>
    %17 = vector.shape_cast %16 : vector<8x16x32xf32> to vector<128x32xf32>
    %c0_9 = arith.constant 0 : index
    %c0_10 = arith.constant 0 : index
    %18 = vector.load %arg6[%c0_9, %c0_10] : memref<32x8xf32, #tpu.memory_space<vmem>>, vector<32x8xf32>
    %cst_11 = arith.constant dense<0.000000e+00> : vector<128x8xf32>
    %19 = tpu.matmul %17, %18, %cst_11 {dimension_numbers = #tpu.dot_dimension_numbers<[1], [0], [0], [1], [0, 0, 1, 1], [], []>} : vector<128x32xf32>, vector<32x8xf32>, vector<128x8xf32> -> vector<128x8xf32>
    %20 = vector.shape_cast %19 : vector<128x8xf32> to vector<8x16x8xf32>
    %cst_12 = arith.constant dense<0xFF800000> : vector<8x8xf32>
    %21 = vector.multi_reduction <maximumf>, %20, %cst_12 [1] : vector<8x16x8xf32> to vector<8x8xf32>
    %22 = vector.shape_cast %21 : vector<8x8xf32> to vector<8x1x8xf32>
    %23 = vector.broadcast %22 : vector<8x1x8xf32> to vector<8x16x8xf32>
    %24 = arith.subf %20, %23 : vector<8x16x8xf32>
    %25 = math.exp %24 : vector<8x16x8xf32>
    %cst_13 = arith.constant dense<0.000000e+00> : vector<8x8xf32>
    %26 = vector.multi_reduction <add>, %25, %cst_13 [1] : vector<8x16x8xf32> to vector<8x8xf32>
    %27 = tpu.reciprocal %26 {approx = true} : vector<8x8xf32> -> vector<8x8xf32>
    %28 = vector.shape_cast %25 : vector<8x16x8xf32> to vector<128x8xf32>
    %c0_14 = arith.constant 0 : index
    %c0_15 = arith.constant 0 : index
    %29 = vector.load %arg7[%c0_14, %c0_15] : memref<8x32xf32, #tpu.memory_space<vmem>>, vector<8x32xf32>
    %cst_16 = arith.constant dense<0.000000e+00> : vector<128x32xf32>
    %30 = tpu.matmul %28, %29, %cst_16 {dimension_numbers = #tpu.dot_dimension_numbers<[1], [0], [0], [1], [0, 0, 1, 1], [], []>} : vector<128x8xf32>, vector<8x32xf32>, vector<128x32xf32> -> vector<128x32xf32>
    %31 = arith.mulf %30, %8 : vector<128x32xf32>
    %32 = vector.shape_cast %31 : vector<128x32xf32> to vector<8x16x32xf32>
    %cst_17 = arith.constant dense<0.000000e+00> : vector<8x32xf32>
    %33 = vector.multi_reduction <add>, %32, %cst_17 [1] : vector<8x16x32xf32> to vector<8x32xf32>
    %c0_18 = arith.constant 0 : index
    %c0_19 = arith.constant 0 : index
    %34 = vector.load %arg7[%c0_18, %c0_19] : memref<8x32xf32, #tpu.memory_space<vmem>>, vector<8x32xf32>
    %cst_20 = arith.constant dense<0.000000e+00> : vector<8x32xf32>
    %35 = tpu.matmul %27, %34, %cst_20 {dimension_numbers = #tpu.dot_dimension_numbers<[1], [0], [0], [1], [0, 0, 1, 1], [], []>} : vector<8x8xf32>, vector<8x32xf32>, vector<8x32xf32> -> vector<8x32xf32>
    %36 = arith.mulf %33, %35 : vector<8x32xf32>
    %c0_21 = arith.constant 0 : index
    %c0_22 = arith.constant 0 : index
    %37 = vector.load %arg4[%c0_21, %c0_22] : memref<32x64xf32, #tpu.memory_space<vmem>>, vector<32x64xf32>
    %cst_23 = arith.constant dense<0.000000e+00> : vector<8x64xf32>
    %38 = tpu.matmul %36, %37, %cst_23 {dimension_numbers = #tpu.dot_dimension_numbers<[1], [0], [0], [1], [0, 0, 1, 1], [], []>} : vector<8x32xf32>, vector<32x64xf32>, vector<8x64xf32> -> vector<8x64xf32>
    %c0_24 = arith.constant 0 : index
    %c0_25 = arith.constant 0 : index
    %39 = vector.load %arg5[%c0_24, %c0_25] : memref<1x64xf32, #tpu.memory_space<vmem>>, vector<1x64xf32>
    %40 = vector.broadcast %39 : vector<1x64xf32> to vector<8x64xf32>
    %41 = arith.addf %38, %40 : vector<8x64xf32>
    %c0_26 = arith.constant 0 : index
    %c0_27 = arith.constant 0 : index
    %42 = vector.load %arg8[%c0_26, %c0_27] : memref<8x64xf32, #tpu.memory_space<vmem>>, vector<8x64xf32>
    tpu.vector_store %arg8[%c0_26, %c0_27], %41 {strides = array<i32>} : memref<8x64xf32, #tpu.memory_space<vmem>>, vector<8x64xf32>,
    return
  }
  func.func @transform_0(%arg0: i32) -> (i32, i32, i32) {
    %c0_i32 = arith.constant 0 : i32
    %c0_i32_0 = arith.constant 0 : i32
    %c0_i32_1 = arith.constant 0 : i32
    return %arg0, %c0_i32, %c0_i32_0 : i32, i32, i32
  }
  func.func @transform_1(%arg0: i32) -> (i32, i32) {
    %c0_i32 = arith.constant 0 : i32
    %c0_i32_0 = arith.constant 0 : i32
    %c0_i32_1 = arith.constant 0 : i32
    return %c0_i32, %c0_i32_0 : i32, i32
  }
  func.func @transform_2(%arg0: i32) -> (i32, i32, i32) {
    %c0_i32 = arith.constant 0 : i32
    %c0_i32_0 = arith.constant 0 : i32
    %c0_i32_1 = arith.constant 0 : i32
    %c0_i32_2 = arith.constant 0 : i32
    return %c0_i32, %c0_i32_0, %c0_i32_1 : i32, i32, i32
  }
  func.func @transform_3(%arg0: i32) -> (i32, i32) {
    %c0_i32 = arith.constant 0 : i32
    %c0_i32_0 = arith.constant 0 : i32
    %c0_i32_1 = arith.constant 0 : i32
    return %c0_i32, %c0_i32_0 : i32, i32
  }
  func.func @transform_4(%arg0: i32) -> (i32, i32) {
    %c0_i32 = arith.constant 0 : i32
    %c0_i32_0 = arith.constant 0 : i32
    %c0_i32_1 = arith.constant 0 : i32
    return %c0_i32, %c0_i32_0 : i32, i32
  }
  func.func @transform_5(%arg0: i32) -> (i32, i32) {
    %c0_i32 = arith.constant 0 : i32
    %c0_i32_0 = arith.constant 0 : i32
    %c0_i32_1 = arith.constant 0 : i32
    return %c0_i32, %c0_i32_0 : i32, i32
  }
  func.func @transform_6(%arg0: i32) -> (i32, i32) {
    %c0_i32 = arith.constant 0 : i32
    %c0_i32_0 = arith.constant 0 : i32
    %c0_i32_1 = arith.constant 0 : i32
    return %c0_i32, %c0_i32_0 : i32, i32
  }
  func.func @transform_7(%arg0: i32) -> (i32, i32) {
    %c0_i32 = arith.constant 0 : i32
    %c0_i32_0 = arith.constant 0 : i32
    return %arg0, %c0_i32 : i32, i32
  }
}

</mosaic_0001>

<bundles_post_ra>
// kernel: tpu_custom_call.1
= control target key start
LH: loop header
LB: loop body
LE: loop exit
PB: predicated region body
PF: predicated region fallthrough
CT: control target
= control target key end

     0   :  { %12 = vsyncpa [#allocation3], 0  ;;  %s3142_s0 = inlined_call_operand.hbm [shape: f32[16,16,32], index: 0, kind: input, shape index: {}]   ;;  %s3143_s1 = inlined_call_operand.vmem [shape: f32[32,32], index: 1, kind: input, shape index: {}]   ;;  %s3144_s2 = inlined_call_operand.hbm [shape: f32[2,32,32], index: 2, kind: input, shape index: {}]   ;;  %s3145_s3 = inlined_call_operand.hbm [shape: f32[32,64], index: 3, kind: input, shape index: {}]   ;;  %s3146_s4 = inlined_call_operand.vmem [shape: f32[1,64], index: 4, kind: input, shape index: {}]   ;;  %s3147_s5 = inlined_call_operand.vmem [shape: f32[32,8], index: 5, kind: input, shape index: {}]   ;;  %s3148_s6 = inlined_call_operand.vmem [shape: f32[8,32], index: 6, kind: input, shape index: {}]   ;;  %s3149_s7 = inlined_call_operand.hbm [shape: f32[16,64], index: 7, kind: output, shape index: {}]  }
   0x1   :  { %14 = vsyncpa [#allocation3 + $0x1], 0 }
   0x2   :  { %15 = vsyncpa [#allocation6], 0 }
   0x3   :  { %16 = vsyncpa [#allocation4], 0 }
   0x4   :  { %18 = vsyncpa [#allocation4 + $0x1], 0  ;;  %s2586_s24 = smov 0   ;;  %s2588_s25 = smov 0  }
   0x5   :  { %s2590_s26 = smov 0   ;;  %s2592_s27 = smov 0  }
   0x6 LB: > { %s2607_s28 = sadd.s32 4294967295, %s2534_s27   ;;  %s1895_s29 = sadd.s32 4294967294, %s2534_s27   ;;  %s2534_s27 = sphi %s2592_s27, %s3171_s27   ;;  %s2530_s26 = sphi %s2590_s26, %s3170_s26   ;;  %s2526_s25 = sphi %s2588_s25, %s3169_s25   ;;  %s2522_s24 = sphi %s2586_s24, %s3168_s24  }
   0x7   : > { %p44_p0 = scmp.ne.s32.totalorder %s2526_s25, %s2522_s24  ;;  %p3150_p1 = scmp.eq.s32.totalorder %s2607_s28, 0 }
   0x8   : > { %p200_p3 = scmp.eq.s32.totalorder %s1895_s29, 1  ;;  %p1896_p5 = scmp.ge.s32.totalorder %s2534_s27, 1 }
   0x9   : > { %p2616_p4 = por %p3150_p1, %p44_p0  ;;  %p207_p7 = scmp.lt.s32.totalorder %s2534_s27, 3 }
   0xa   : > { %p2621_p6 = por %p200_p3, %p44_p0  ;;  %s2536_s10 = smov [#allocation5]  }
   0xb   : > { %s3154_s30 = scalar_select %p2616_p4, 1, 0 }
   0xc   : > { %s3155_s8 = scalar_select %p2621_p6, 1, 0 }
   0xd   : > { %p2626_p8 = pnand %p1896_p5, %p207_p7  ;;  %s222_s11 = sshll.u32 %s2536_s10, 4  ;;  %s2630_s11 = int_to_ptr.vmem [resolvable:$true] %s222_s11 }
   0xe   : > { %s2537_s13 = smov [#allocation7]   ;;  %s2378_s17 = scalar_lea.hbm %s3144_s2, 1024 }
   0xf   : > { %p2269_p9 = pneg %p2626_p8  ;;  %s235_s14 = sshll.u32 %s2537_s13, 4  ;;  %s2641_s14 = int_to_ptr.vmem [resolvable:$true] %s235_s14 }
  0x10   : > { %p2379_p12 = scmp.ne.s32.totalorder %s3144_s2, %s2378_s17  ;;  %p2385_p5 = scmp.lt.u32.totalorder %s2378_s17, %s3144_s2 }
  0x11   : > { %p2637_p11 = pnand %p2269_p9, %p3150_p1 }
  0x13   : > { %p2380_p13 = pneg %p2637_p11 }
  0x15   : > { %p2381_p0 = pnand %p2380_p13, %p2379_p12 }
  0x17   : > { %p2382_p3 = pneg %p2381_p0 }
  0x19   : > { %p2387_p7 = pnand %p2385_p5, %p2382_p3 }
  0x1b   : > { %2390 = shalt.err (!%p2387_p7)
}
  0x1c   : > { %s2391_s22 = scalar_lea.vmem %s2630_s11, 1024  ;;  %p2399_p2 = scmp.lt.s32.totalorder %s2630_s11, %s2630_s11 }
  0x1d   : > { %p2392_p9 = scmp.ne.s32.totalorder %s2630_s11, %s2391_s22  ;;  %p2400_p12 = scmp.lt.s32.totalorder %s2391_s22, %s2391_s22 }
  0x1f   : > { %p2394_p10 = pnand %p2392_p9, %p2380_p13  ;;  %p2401_p0 = por %p2400_p12, %p2399_p2 }
  0x21   : > { %p2395_p1 = pneg %p2394_p10 }
  0x23   : > { %p2402_p6 = pnand %p2401_p0, %p2395_p1 }
  0x25   : > { %2405 = shalt.err (!%p2402_p6)
}
  0x26   : > { %s3151_s23 = smov 128   ;;  %s2539_s29 = smov 8  }
  0x27   : > { %2272 = dma.hbm_to_vmem [thread:$0]  (!%p2637_p11), %s3144_s2, 1024, %s2630_s11, [#allocation6], %s3151_s23, %s3151_s23, %s2539_s29  }
  0x28   : > { %s2406_s17 = scalar_lea.hbm %s3145_s3, 512 }
  0x29   : > { %p2407_p1 = scmp.ne.s32.totalorder %s3145_s3, %s2406_s17  ;;  %p2413_p10 = scmp.lt.u32.totalorder %s2406_s17, %s3145_s3 }
  0x2b   : > { %p2409_p2 = pnand %p2407_p1, %p2380_p13 }
  0x2d   : > { %p2410_p6 = pneg %p2409_p2 }
  0x2f   : > { %p2415_p3 = pnand %p2413_p10, %p2410_p6 }
  0x31   : > { %2418 = shalt.err (!%p2415_p3)
}
  0x32   : > { %s2419_s11 = scalar_lea.vmem %s2641_s14, 512  ;;  %p2427_p12 = scmp.lt.s32.totalorder %s2641_s14, %s2641_s14 }
  0x33   : > { %p2420_p5 = scmp.ne.s32.totalorder %s2641_s14, %s2419_s11  ;;  %p2428_p0 = scmp.lt.s32.totalorder %s2419_s11, %s2419_s11 }
  0x35   : > { %p2422_p7 = pnand %p2420_p5, %p2380_p13  ;;  %p2429_p1 = por %p2428_p0, %p2427_p12 }
  0x37   : > { %p2423_p9 = pneg %p2422_p7 }
  0x39   : > { %p2430_p2 = pnand %p2429_p1, %p2423_p9 }
  0x3b   : > { %2433 = shalt.err (!%p2430_p2)
}
  0x3c   : > { %2275 = dma.hbm_to_vmem [thread:$0]  (!%p2637_p11), %s3145_s3, 512, %s2641_s14, [#allocation6], %s3151_s23, %s3151_s23, %s2539_s29  }
  0x3d   : > { %s2702_s12 = sadd.s32 1, %s2534_s27   ;;  %s31_s13 = sadd.s32 1, %s2530_s26 }
  0x3e   : > { %s28_s15 = ssub.s32 %s2534_s27, %s2702_s12  ;;  %p38_p13 = scmp.ne.s32.totalorder %s2530_s26, %s2526_s25 }
  0x3f   : > { %p29_p6 = scmp.eq.s32.totalorder %s28_s15, 0  ;;  %p39_p10 = scmp.eq.s32.totalorder %s2534_s27, 0 }
  0x40   : > { %p3158_p3 = scmp.eq.s32.totalorder %s2607_s28, 1  ;;  %p2286_p7 = scmp.lt.s32.totalorder %s2534_s27, 2 }
  0x41   : > { %s2718_s17 = scalar_select %p29_p6, %s2530_s26, %s31_s13  }
  0x42   : > { %p2712_p5 = por %p3158_p3, %p38_p13  ;;  %p40_p9 = por %p39_p10, %p38_p13 }
  0x43   : > { %s258_s18 = sand.u32 1, %s2530_s26   ;;  %s1982_s14 = sshll.u32 %s2534_s27, 11 }
  0x44   : > { %s3159_s16 = scalar_select %p2712_p5, 1, 0 }
  0x45   : > { %s1900_s19 = sshll.u32 %s258_s18, 7  ;;  %s2725_s11 = scalar_lea.hbm %s3142_s0, %s1982_s14 }
  0x46   : > { %s262_s22 = scalar_lea.vmem [#allocation2], %s1900_s19  ;;  %p2729_p11 = pnand %p2286_p7, %p40_p9 }
  0x47   : > { %s270_s10 = sshll.u32 %s262_s22, 4  ;;  %s2733_s15 = scalar_lea.sflag [#allocation3], %s258_s18  ;;  %s2727_s10 = int_to_ptr.vmem [resolvable:$true] %s270_s10 }
  0x48   : > { %s2434_s23 = scalar_lea.hbm %s2725_s11, 2048  ;;  %p2436_p0 = pneg %p2729_p11 }
  0x49   : > { %p2435_p12 = scmp.ne.s32.totalorder %s2725_s11, %s2434_s23  ;;  %s2439_s20 = scalar_lea.hbm %s3142_s0, 4096 }
  0x4a   : > { %p2440_p13 = scmp.lt.u32.totalorder %s2725_s11, %s3142_s0  ;;  %p2441_p6 = scmp.lt.u32.totalorder %s2439_s20, %s2434_s23 }
  0x4b   : > { %p2437_p1 = pnand %p2436_p0, %p2435_p12  ;;  %p2443_p3 = scmp.lt.u32.totalorder %s2434_s23, %s2725_s11 }
  0x4c   : > { %p2442_p10 = por %p2441_p6, %p2440_p13 }
  0x4d   : > { %p2438_p2 = pneg %p2437_p1 }
  0x4e   : > { %p2444_p7 = por %p2443_p3, %p2442_p10 }
  0x50   : > { %p2445_p9 = pnand %p2444_p7, %p2438_p2 }
  0x52   : > { %2448 = shalt.err (!%p2445_p9)
}
  0x53   : > { %s2449_s18 = scalar_lea.vmem %s2727_s10, 2048  ;;  %s2540_s19 = smov [#allocation2]  }
  0x54   : > { %p2450_p12 = scmp.ne.s32.totalorder %s2727_s10, %s2449_s18  ;;  %s2454_s14 = sshll.u32 %s2540_s19, 4  ;;  %s2455_s14 = int_to_ptr.vmem [resolvable:$false] %s2454_s14 }
  0x55   : > { %s2456_s21 = scalar_lea.vmem %s2455_s14, 4096  ;;  %p2457_p4 = scmp.lt.s32.totalorder %s2727_s10, %s2455_s14 }
  0x56   : > { %p2452_p1 = pnand %p2450_p12, %p2436_p0  ;;  %p2458_p13 = scmp.lt.s32.totalorder %s2456_s21, %s2449_s18 }
  0x58   : > { %p2453_p5 = pneg %p2452_p1  ;;  %p2459_p6 = por %p2458_p13, %p2457_p4 }
  0x5a   : > { %p2460_p10 = pnand %p2459_p6, %p2453_p5 }
  0x5c   : > { %2463 = shalt.err (!%p2460_p10)
}
  0x5d   : > { %s3161_s23 = smov 128   ;;  %282 = sbr.rel (%p2626_p8) target bundleno = 1125 (0x465), region = 48 }
  0x5e   : > { %2279 = dma.hbm_to_vmem [thread:$0]  (!%p2729_p11), %s2725_s11, 2048, %s2727_s10, %s2733_s15, %s3161_s23, %s3161_s23, %s2539_s29  }
  0x5f   : > { %s2767_s20 = sand.u32 (!%p2626_p8), 1, %s2526_s25   ;;  %p3162_p4 = scmp.ne.s32.totalorder (!%p2626_p8), %s3154_s30, 0 }
  0x60   : > { %s1905_s22 = sshll.u32 (!%p2626_p8), %s2767_s20, 7  ;;  %s285_s18 = scalar_lea.sflag (!%p2626_p8), [#allocation3], %s2767_s20 }
  0x61   : > { %s2771_s19 = scalar_lea.vmem (!%p2626_p8), [#allocation2], %s1905_s22 }
  0x64   : > { %2509 = dma.done.wait (%p3162_p4), %s285_s18, 2048  }
  0x65   : > { %2511 = vsyncadd (%p3162_p4), %s285_s18, 4294965248  ;;  %p3163_p5 = scmp.eq.s32.totalorder %s2607_s28, 0 }
  0x67   : > { %2513 = dma.done.wait (%p3163_p5), [#allocation6], 1536   ;;  %p3164_p8 = pmov %p3163_p5 }
  0x68   : > { %vm352_vm0 = vcmask 261120   ;;  %v344_v0 = vld [vmem:[#allocation5] sm:$0xff]  ;;  %v345_v1 = vld [vmem:[#allocation5 + $0x8] sm:$0xff]  ;;  %v346_v2 = vld [vmem:[#allocation5 + $0x10] sm:$0xff]  ;;  %v2541_v11 = vmov 0.0|0.0   ;;  %vm696_vm1 = vcmask 1041409  }
  0x69   : > { %2515 = vsyncadd (%p3164_p8), [#allocation6], 4294965760  ;;  %v2221_v3 = vpack.c.bf16 %v345_v1, %v344_v0  ;;  %v347_v4 = vld [vmem:[#allocation5 + $0x18] sm:$0xff]  ;;  %v328_v5 = vld [vmem:[%s2771_s19] sm:$0xff]  ;;  %vm699_vm2 = vcmask 1042434   ;;  %vm702_vm3 = vcmask 1043459  }
  0x6a   : > { %v2225_v6 = vpack.c.bf16 %v347_v4, %v346_v2  ;;  %2080 = vmatprep.mubr.msk.f32.mxu0 %vm352_vm0, %v328_v5  ;;  %2112 = vmatprep.mubr.msk.f32.mxu1 %vm352_vm0, %v328_v5  ;;  %v691_v7 = vld [vmem:[%s3143_s1] sm:$0xff]  ;;  %v692_v8 = vld [vmem:[%s3143_s1 + $0x8] sm:$0xff]  ;;  %v2795_v12 = vld [vmem:[%s2771_s19 + $0x10] sm:$0xff]  ;;  %vm705_vm4 = vcmask 1044484   ;;  %vm708_vm5 = vcmask 1045509   ;;  %vm711_vm6 = vcmask 1046534  }
  0x6b   : > { %2222 = vmatprep.subr.bf16.mxu0 %v2221_v3  ;;  %v2791_v9 = vld [vmem:[%s2771_s19 + $0x8] sm:$0xff]  ;;  %v2238_v10 = vpack.c.bf16 %v692_v8, %v691_v7  ;;  %v693_v13 = vld [vmem:[%s3143_s1 + $0x10] sm:$0xff]  ;;  %v694_v14 = vld [vmem:[%s3143_s1 + $0x18] sm:$0xff]  ;;  %v695_v20 = vrot.slane %v2795_v12, 7  ;;  %vm714_vm7 = vcmask 1047559   ;;  %vm2542_vm8 = vmmov 0  }
  0x6c   : > { %2224 = vmatpush3.bf16.msra.mxu0 %v2221_v3  ;;  %v2808_v15 = vld [vmem:[%s2771_s19 + $0x18] sm:$0xff]  ;;  %v2241_v16 = vpack.c.bf16 %v694_v14, %v693_v13  ;;  %v2811_v17 = vld [vmem:[%s2771_s19 + $0x20] sm:$0xff]  ;;  %v2819_v18 = vld [vmem:[%s2771_s19 + $0x28] sm:$0xff]  ;;  %v2543_v42 = vmov 0.0   ;;  %v2544_v4 = vmov 1966171168  }
  0x6d   : > { %2226 = vmatprep.subr.bf16.mxu0 %v2225_v6  ;;  %v2822_v19 = vld [vmem:[%s2771_s19 + $0x30] sm:$0xff]  ;;  %v335_v21 = vld [vmem:[%s2771_s19 + $0x38] sm:$0xff]  ;;  %v698_v22 = vrot.slane %v2811_v17, 6  ;;  %v336_v23 = vld [vmem:[%s2771_s19 + $0x40] sm:$0xff]  ;;  %v697_v24 = vsel %vm696_vm1, %v695_v20, %v328_v5  ;;  %v791_v5 = vunpack.c.l.s4 %v2544_v4  ;;  %vm1091_vm9 = vcmask 64512   ;;  %s1908_s13 = sshll.u32 %s2767_s20, 3 }
  0x6e   : > { %v701_v25 = vrot.slane %v2822_v19, 5  ;;  %v337_v26 = vld [vmem:[%s2771_s19 + $0x48] sm:$0xff]  ;;  %v338_v28 = vld [vmem:[%s2771_s19 + $0x50] sm:$0xff]  ;;  %v704_v29 = vrot.slane %v336_v23, 4  ;;  %v339_v31 = vld [vmem:[%s2771_s19 + $0x58] sm:$0xff]  ;;  %s1978_s21 = sshll.u32 %s2607_s28, 7 }
  0x6f   : > { %v700_v27 = vsel %vm699_vm2, %v698_v22, %v697_v24  ;;  %v340_v32 = vld [vmem:[%s2771_s19 + $0x60] sm:$0xff]  ;;  %v707_v33 = vrot.slane %v338_v28, 3  ;;  %v341_v35 = vld [vmem:[%s2771_s19 + $0x68] sm:$0xff]  ;;  %v342_v37 = vld [vmem:[%s2771_s19 + $0x70] sm:$0xff]  ;;  %s326_s23 = scalar_lea.vmem [#allocation8], %s1908_s13  ;;  %vm1790_vm10 = vcmask 523264   ;;  %s3098_s30 = scalar_lea.hbm %s3149_s7, %s1978_s21 }
  0x70   : > { %2228 = vmatpush3.bf16.msra.mxu0 %v2225_v6  ;;  %v703_v30 = vsel %vm702_vm3, %v701_v25, %v700_v27  ;;  %v710_v36 = vrot.slane %v340_v32, 2  ;;  %v713_v39 = vrot.slane %v342_v37, 1  ;;  %v343_v40 = vld [vmem:[%s2771_s19 + $0x78] sm:$0xff]  ;;  %v348_v44 = vld [vmem:[#allocation5 + $0x20] sm:$0xff]  ;;  %v349_v45 = vld [vmem:[#allocation5 + $0x28] sm:$0xff]  ;;  %v793_v6 = vlaneseq  ;;  %s1806_s22 = sshll.u32 %s326_s23, 4  ;;  %s3100_s22 = int_to_ptr.vmem [resolvable:$true] %s1806_s22 }
  0x71   : > { %2237 = vmatprep.subr.bf16.mxu0 %v2541_v11  ;;  %v706_v34 = vsel %vm705_vm4, %v704_v29, %v703_v30  ;;  %v2229_v46 = vpack.c.bf16 %v349_v45, %v348_v44  ;;  %v350_v47 = vld [vmem:[#allocation5 + $0x30] sm:$0xff]  ;;  %v351_v48 = vld [vmem:[#allocation5 + $0x38] sm:$0xff]  ;;  %v894_v50 = vld [vmem:[%s3147_s5] sm:$0xff]  ;;  %s1793_s9 = scalar_lea.sflag [#allocation4], %s2767_s20  ;;  %s2464_s29 = scalar_lea.vmem %s3100_s22, 128 }
  0x72   : > { %v709_v38 = vsel %vm708_vm5, %v707_v33, %v706_v34  ;;  %v2233_v49 = vpack.c.bf16 %v351_v48, %v350_v47  ;;  %v895_v51 = vld [vmem:[%s3147_s5 + $0x8] sm:$0xff]  ;;  %v896_v53 = vld [vmem:[%s3147_s5 + $0x10] sm:$0xff]  ;;  %v897_v54 = vld [vmem:[%s3147_s5 + $0x18] sm:$0xff]  ;;  %p2465_p11 = scmp.ne.s32.totalorder %s3100_s22, %s2464_s29  ;;  %p3165_p0 = scmp.ne.s32.totalorder %s3159_s16, 0 }
  0x73   : > { %2081 = vmatmul.mubr.msk.f32.vlgmr.msra.gmra.mrb[0].mxu0 %vm352_vm0, %v2791_v9  ;;  %v712_v41 = vsel %vm711_vm6, %v710_v36, %v709_v38  ;;  %2230 = vmatprep.subr.bf16.mxu1 %v2229_v46  ;;  %v2243_v52 = vpack.c.bf16 %v895_v51, %v894_v50  ;;  %v2247_v55 = vpack.c.bf16 %v897_v54, %v896_v53  ;;  %s2545_s28 = smov [#allocation8]  }
  0x74   : > { %2239 = vmatpush3.bf16.msra.mxu0 %v2238_v10  ;;  %2083 = vmatprep.mubr.msk.f32.mxu0 %vm352_vm0, %v2795_v12  ;;  %v715_v43 = vsel %vm714_vm7, %v713_v39, %v712_v41  ;;  %v794_v10 = vshrl.u32 %v793_v6, 7  ;;  %p2466_p2 = pnand %p2465_p11, %p3165_p0  ;;  %s2468_s11 = sshll.u32 %s2545_s28, 4  ;;  %s2469_s11 = int_to_ptr.vmem [resolvable:$false] %s2468_s11 }
  0x75   : > { %2240 = vmatprep.subr.bf16.mxu0 %v2541_v11  ;;  %2232 = vmatpush3.bf16.msra.mxu1 %v2229_v46  ;;  %s2470_s10 = scalar_lea.vmem %s2469_s11, 256  ;;  %p2471_p7 = scmp.lt.s32.totalorder %s3100_s22, %s2469_s11 }
  0x76   : > { %2234 = vmatprep.subr.bf16.mxu1 %v2233_v49  ;;  %p2467_p3 = pneg %p2466_p2  ;;  %p2472_p9 = scmp.lt.s32.totalorder %s2470_s10, %s2464_s29 }
  0x77   : > { %2084 = vmatmul.mubr.msk.f32.gmra.mrb[2].mxu0 %vm352_vm0, %v2808_v15 }
  0x78   : > { %2086 = vmatprep.mubr.msk.f32.mxu0 %vm352_vm0, %v2811_v17  ;;  %2242 = vmatpush3.bf16.msra.mxu0 %v2241_v16  ;;  %p2473_p12 = por %p2472_p9, %p2471_p7 }
  0x79   : > { %2236 = vmatpush3.bf16.msra.mxu1 %v2233_v49 }
  0x7a   : > { %2244 = vmatprep.subr.bf16.mxu1 %v2243_v52  ;;  %p2474_p1 = pnand %p2473_p12, %p2467_p3 }
  0x7b   : > { %2087 = vmatmul.mubr.msk.f32.gmra.mrb[4].mxu0 %vm352_vm0, %v2819_v18 }
  0x7c   : > { %2089 = vmatprep.mubr.msk.f32.mxu0 %vm352_vm0, %v2822_v19  ;;  %2113 = vmatmul.mubr.msk.f32.vlgmr.msra.gmra.mrb[0].mxu1 %vm352_vm0, %v2791_v9  ;;  %v792_v9 = vunpack.c.0.s8 %v791_v5 }
  0x7d   : > { %2115 = vmatprep.mubr.msk.f32.mxu1 %vm352_vm0, %v2795_v12  ;;  %2246 = vmatpush3.bf16.msra.mxu1 %v2243_v52 }
  0x7e   : > { %2248 = vmatprep.subr.bf16.mxu1 %v2247_v55  ;;  %v795_v14 = vsub.s32 %v792_v9, %v794_v10 }
  0x7f   : > { %2090 = vmatmul.mubr.msk.f32.gmra.mrb[6].mxu0 %vm352_vm0, %v335_v21 }
  0x80   : > { %2092 = vmatprep.mubr.msk.f32.mxu0 %vm352_vm0, %v336_v23  ;;  %2116 = vmatmul.mubr.msk.f32.gmra.mrb[2].mxu1 %vm352_vm0, %v2808_v15 }
  0x81   : > { %2118 = vmatprep.mubr.msk.f32.mxu1 %vm352_vm0, %v2811_v17  ;;  %2250 = vmatpush3.bf16.msra.mxu1 %v2247_v55 }
  0x82   : > { %2205 = vmatprep.subr.mxu1 %v2543_v42 }
  0x83   : > { %2093 = vmatmul.mubr.msk.f32.gmra.mrb[8].mxu0 %vm352_vm0, %v337_v26 }
  0x84   : > { %2095 = vmatprep.mubr.msk.f32.mxu0 %vm352_vm0, %v338_v28  ;;  %2119 = vmatmul.mubr.msk.f32.gmra.mrb[4].mxu1 %vm352_vm0, %v2819_v18 }
  0x85   : > { %2121 = vmatprep.mubr.msk.f32.mxu1 %vm352_vm0, %v2822_v19  ;;  %v840_v19 = vsub.s32 0, %v794_v10 }
  0x87   : > { %2096 = vmatmul.mubr.msk.f32.gmra.mrb[10].mxu0 %vm352_vm0, %v339_v31 }
  0x88   : > { %2098 = vmatprep.mubr.msk.f32.mxu0 %vm352_vm0, %v340_v32  ;;  %2122 = vmatmul.mubr.msk.f32.gmra.mrb[6].mxu1 %vm352_vm0, %v335_v21 }
  0x89   : > { %2124 = vmatprep.mubr.msk.f32.mxu1 %vm352_vm0, %v336_v23 }
  0x8b   : > { %2099 = vmatmul.mubr.msk.f32.gmra.mrb[12].mxu0 %vm352_vm0, %v341_v35 }
  0x8c   : > { %2101 = vmatprep.mubr.msk.f32.mxu0 %vm352_vm0, %v342_v37  ;;  %2125 = vmatmul.mubr.msk.f32.gmra.mrb[8].mxu1 %vm352_vm0, %v337_v26 }
  0x8d   : > { %2127 = vmatprep.mubr.msk.f32.mxu1 %vm352_vm0, %v338_v28 }
  0x8f   : > { %2102 = vmatmul.mubr.msk.f32.gmra.mrb[14].mxu0 %vm352_vm0, %v343_v40 }
  0x90   : > { %2144 = vmatprep.mubr.msk.f32.mxu0 %vm2542_vm8, %v2543_v42  ;;  %2128 = vmatmul.mubr.msk.f32.gmra.mrb[10].mxu1 %vm352_vm0, %v339_v31 }
  0x91   : > { %2130 = vmatprep.mubr.msk.f32.mxu1 %vm352_vm0, %v340_v32 }
  0x93   : > { %2145 = vmatmul.mubr.msk.f32.vlgmr.msra.gmra.mrb[16].mxu0 %vm352_vm0, %v715_v43 }
  0x94   : > { %2131 = vmatmul.mubr.msk.f32.gmra.mrb[12].mxu1 %vm352_vm0, %v341_v35 }
  0x95   : > { %2133 = vmatprep.mubr.msk.f32.mxu1 %vm352_vm0, %v342_v37 }
  0x98   : > { %2134 = vmatmul.mubr.msk.f32.gmra.mrb[14].mxu1 %vm352_vm0, %v343_v40 }
 0x146   : > { %v2082_v56 = vpop.f32.mrb[0].mxu0 }
 0x147   : > { %v467_v57 = vpop.f32.mrb[1].mxu0 }
 0x14a   : > { %v2085_v58 = vpop.f32.mrb[2].mxu0 }
 0x14b   : > { %v477_v59 = vpop.f32.mrb[3].mxu0 }
 0x14e   : > { %v2088_v60 = vpop.f32.mrb[4].mxu0 }
 0x14f   : > { %v487_v61 = vpop.f32.mrb[5].mxu0 }
 0x152   : > { %v2091_v62 = vpop.f32.mrb[6].mxu0 }
 0x153   : > { %v497_v63 = vpop.f32.mrb[7].mxu0 }
 0x156   : > { %v2094_v0 = vpop.f32.mrb[8].mxu0 }
 0x157   : > { %v507_v1 = vpop.f32.mrb[9].mxu0 }
 0x15a   : > { %v2097_v2 = vpop.f32.mrb[10].mxu0 }
 0x15b   : > { %v517_v3 = vpop.f32.mrb[11].mxu0 }
 0x15e   : > { %v2100_v7 = vpop.f32.mrb[12].mxu0 }
 0x15f   : > { %v527_v8 = vpop.f32.mrb[13].mxu0 }
 0x162   : > { %v2103_v12 = vpop.f32.mrb[14].mxu0 }
 0x163   : > { %v537_v13 = vpop.f32.mrb[15].mxu0 }
 0x166   : > { %v784_v15 = vpop.f32.mrb[16].mxu0 }
 0x167   : > { %v789_v16 = vcombine.high %v784_v15, %v784_v15  ;;  %v796_v17 = vrot.slane %v784_v15, %v795_v14  ;;  %v2146_v18 = vpop.f32.mrb[17].mxu0 }
 0x169   : > { %v803_v20 = vrot.slane %v789_v16, %v795_v14  ;;  %v804_v21 = vcombine.high %v796_v17, %v796_v17  ;;  %v812_v22 = vrot.slane %v796_v17, %v795_v14 }
 0x16b   : > { %v805_v23 = vcombine.high %v803_v20, %v803_v20  ;;  %v819_v24 = vrot.slane %v803_v20, %v795_v14  ;;  %v826_v25 = vrot.slane %v804_v21, %v795_v14  ;;  %v834_v26 = vcombine.high %v812_v22, %v812_v22 }
 0x16c   : > { %v841_v27 = vrot.slane %v812_v22, %v840_v19 }
 0x16d   : > { %v833_v28 = vrot.slane %v805_v23, %v795_v14  ;;  %v835_v29 = vcombine.high %v819_v24, %v819_v24  ;;  %v836_v30 = vcombine.high %v826_v25, %v826_v25  ;;  %v845_v31 = vrot.slane %v826_v25, %v840_v19 }
 0x16e   : > { %v849_v32 = vrot.slane %v834_v26, %v840_v19  ;;  %v857_v33 = vrot.slane %v819_v24, %v840_v19  ;;  %v879_v34 = vmul.f32 %v2082_v56, %v841_v27  ;;  %v878_v35 = vmul.f32 %v841_v27, %v467_v57  ;;  %v2911_v56 = vpop.f32.mrb[0].mxu1 }
 0x16f   : > { %v837_v36 = vcombine.high %v833_v28, %v833_v28  ;;  %v880_v37 = vmul.f32 %v845_v31, %v477_v59  ;;  %v881_v38 = vmul.f32 %v2085_v58, %v845_v31  ;;  %v853_v39 = vrot.slane %v836_v30, %v840_v19  ;;  %v2913_v57 = vpop.f32.mrb[1].mxu1 }
 0x170   : > { %2155 = vmatprep.mubr.msk.f32.mxu1 %vm352_vm0, %v878_v35  ;;  %v882_v40 = vmul.f32 %v849_v32, %v487_v61  ;;  %v883_v41 = vmul.f32 %v2088_v60, %v849_v32  ;;  %v886_v43 = vmul.f32 %v857_v33, %v507_v1  ;;  %v887_v44 = vmul.f32 %v2094_v0, %v857_v33  ;;  %v2915_v58 = vpop.f32.mrb[2].mxu1 }
 0x171   : > { %2156 = vmatmul.mubr.msk.f32.vlgmr.msra.gmra.mrb[16].mxu1 %vm352_vm0, %v879_v34  ;;  %v884_v45 = vmul.f32 %v853_v39, %v497_v63  ;;  %v885_v46 = vmul.f32 %v2091_v62, %v853_v39  ;;  %v861_v47 = vrot.slane %v833_v28, %v840_v19  ;;  %v865_v48 = vrot.slane %v835_v29, %v840_v19  ;;  %v2917_v59 = vpop.f32.mrb[3].mxu1 }
 0x172   : > { %2158 = vmatprep.mubr.msk.f32.mxu1 %vm352_vm0, %v880_v37  ;;  %v869_v49 = vrot.slane %v837_v36, %v840_v19  ;;  %v2919_v60 = vpop.f32.mrb[4].mxu1 }
 0x173   : > { %v888_v50 = vmul.f32 %v861_v47, %v517_v3  ;;  %v889_v51 = vmul.f32 %v2097_v2, %v861_v47  ;;  %v890_v52 = vmul.f32 %v865_v48, %v527_v8  ;;  %v891_v53 = vmul.f32 %v2100_v7, %v865_v48  ;;  %v2921_v61 = vpop.f32.mrb[5].mxu1  ;;  %v1292_v8 = vld [vmem:[%s3148_s6] sm:$0xff] }
 0x174   : > { %v892_v54 = vmul.f32 %v869_v49, %v537_v13  ;;  %v893_v55 = vmul.f32 %v2103_v12, %v869_v49  ;;  %v2923_v62 = vpop.f32.mrb[6].mxu1  ;;  %2179 = vmatprep.subr.mxu0 %v1292_v8  ;;  %2206 = vmatpush3.msra.mxu1 %v1292_v8 }
 0x175   : > { %2159 = vmatmul.mubr.msk.f32.gmra.mrb[18].mxu1 %vm352_vm0, %v881_v38  ;;  %v2925_v63 = vpop.f32.mrb[7].mxu1  ;;  %2180 = vmatpush3.msra.mxu0 %v1292_v8 }
 0x176   : > { %2161 = vmatprep.mubr.msk.f32.mxu1 %vm352_vm0, %v882_v40  ;;  %v2927_v0 = vpop.f32.mrb[8].mxu1  ;;  %2251 = vmatprep.subr.bf16.mxu0 %v2541_v11 }
 0x177   : > { %v2929_v1 = vpop.f32.mrb[9].mxu1 }
 0x178   : > { %v2931_v2 = vpop.f32.mrb[10].mxu1 }
 0x179   : > { %2162 = vmatmul.mubr.msk.f32.gmra.mrb[20].mxu1 %vm352_vm0, %v883_v41  ;;  %v2933_v3 = vpop.f32.mrb[11].mxu1 }
 0x17a   : > { %2164 = vmatprep.mubr.msk.f32.mxu1 %vm352_vm0, %v884_v45  ;;  %v2935_v4 = vpop.f32.mrb[12].mxu1 }
 0x17b   : > { %v2937_v5 = vpop.f32.mrb[13].mxu1 }
 0x17c   : > { %v2939_v6 = vpop.f32.mrb[14].mxu1 }
 0x17d   : > { %2165 = vmatmul.mubr.msk.f32.gmra.mrb[22].mxu1 %vm352_vm0, %v885_v46  ;;  %v2941_v7 = vpop.f32.mrb[15].mxu1 }
 0x17e   : > { %2167 = vmatprep.mubr.msk.f32.mxu1 %vm352_vm0, %v886_v43 }
 0x181   : > { %2168 = vmatmul.mubr.msk.f32.gmra.mrb[24].mxu1 %vm352_vm0, %v887_v44 }
 0x182   : > { %2170 = vmatprep.mubr.msk.f32.mxu1 %vm352_vm0, %v888_v50 }
 0x185   : > { %2171 = vmatmul.mubr.msk.f32.gmra.mrb[26].mxu1 %vm352_vm0, %v889_v51 }
 0x186   : > { %2173 = vmatprep.mubr.msk.f32.mxu1 %vm352_vm0, %v890_v52 }
 0x189   : > { %2174 = vmatmul.mubr.msk.f32.gmra.mrb[28].mxu1 %vm352_vm0, %v891_v53 }
 0x18a   : > { %2176 = vmatprep.mubr.msk.f32.mxu1 %vm352_vm0, %v892_v54 }
 0x18d   : > { %2177 = vmatmul.mubr.msk.f32.gmra.mrb[30].mxu1 %vm352_vm0, %v893_v55 }
 0x18e   : > { %2207 = vmatprep.mubr.msk.f32.mxu1 %vm2542_vm8, %v2543_v42 }
 0x244   : > { %v2157_v9 = vpop.f32.mrb[16].mxu1 }
 0x245   : > { %v1093_v10 = vsel %vm1091_vm9, %v2157_v9, -inf  ;;  %v1012_v12 = vpop.f32.mrb[17].mxu1 }
 0x246   : > { %v1092_v13 = vsel %vm1091_vm9, %v1012_v12, -inf }
 0x247   : > { %v1094_v14 = vmax.f32 %v1092_v13, %v1093_v10 }
 0x248   : > { %v2160_v15 = vpop.f32.mrb[18].mxu1 }
 0x249   : > { %v1095_v16 = vrot.slane %v1094_v14, 4  ;;  %v1102_v17 = vsel %vm1091_vm9, %v2160_v15, -inf  ;;  %v1022_v18 = vpop.f32.mrb[19].mxu1 }
 0x24a   : > { %v1101_v19 = vsel %vm1091_vm9, %v1022_v18, -inf }
 0x24b   : > { %v1096_v20 = vmax.f32 %v1094_v14, %v1095_v16  ;;  %v1103_v21 = vmax.f32 %v1101_v19, %v1102_v17 }
 0x24c   : > { %v2951_v22 = vpop.f32.mrb[20].mxu1 }
 0x24d   : > { %v1097_v23 = vrot.slane %v1096_v20, 2  ;;  %v1104_v24 = vrot.slane %v1103_v21, 4  ;;  %v1111_v25 = vsel %vm1091_vm9, %v2951_v22, -inf  ;;  %v1032_v26 = vpop.f32.mrb[21].mxu1 }
 0x24e   : > { %v1110_v27 = vsel %vm1091_vm9, %v1032_v26, -inf }
 0x24f   : > { %v1098_v28 = vmax.f32 %v1096_v20, %v1097_v23  ;;  %v1105_v29 = vmax.f32 %v1103_v21, %v1104_v24  ;;  %v1112_v30 = vmax.f32 %v1110_v27, %v1111_v25 }
 0x250   : > { %v2956_v31 = vpop.f32.mrb[22].mxu1 }
 0x251   : > { %v1099_v32 = vrot.slane %v1098_v28, 1  ;;  %v1106_v33 = vrot.slane %v1105_v29, 2  ;;  %v1113_v34 = vrot.slane %v1112_v30, 4  ;;  %v1120_v35 = vsel %vm1091_vm9, %v2956_v31, -inf  ;;  %v2960_v36 = vpop.f32.mrb[23].mxu1 }
 0x252   : > { %v1119_v37 = vsel %vm1091_vm9, %v2960_v36, -inf }
 0x253   : > { %v1100_v38 = vmax.f32 %v1098_v28, %v1099_v32  ;;  %v1107_v39 = vmax.f32 %v1105_v29, %v1106_v33  ;;  %v1114_v40 = vmax.f32 %v1112_v30, %v1113_v34  ;;  %v1121_v41 = vmax.f32 %v1119_v37, %v1120_v35 }
 0x254   : > { %v2964_v43 = vpop.f32.mrb[24].mxu1 }
 0x255   : > { %v1164_v44 = vsub.f32 %v1012_v12, %v1100_v38  ;;  %v1165_v45 = vsub.f32 %v2157_v9, %v1100_v38  ;;  %v1108_v46 = vrot.slane %v1107_v39, 1  ;;  %v1115_v47 = vrot.slane %v1114_v40, 2  ;;  %v2966_v48 = vpop.f32.mrb[25].mxu1 }
 0x256   : > { %v1122_v49 = vrot.slane %v1121_v41, 4  ;;  %v1129_v50 = vsel %vm1091_vm9, %v2964_v43, -inf  ;;  %v1128_v51 = vsel %vm1091_vm9, %v2966_v48, -inf }
 0x257   : > { %v1180_v52 = vmul.f32 1.442695, %v1164_v44  ;;  %v1182_v53 = vmul.f32 1.442695, %v1165_v45  ;;  %v1109_v54 = vmax.f32 %v1107_v39, %v1108_v46  ;;  %v1116_v55 = vmax.f32 %v1114_v40, %v1115_v47 }
 0x258   : > { %v1123_v8 = vmax.f32 %v1121_v41, %v1122_v49  ;;  %v1130_v10 = vmax.f32 %v1128_v51, %v1129_v50  ;;  %v2972_v13 = vpop.f32.mrb[26].mxu1 }
 0x259   : > { %2330 = vpow2.f32 %v1180_v52  ;;  %v1166_v9 = vsub.f32 %v1022_v18, %v1109_v54  ;;  %v1167_v12 = vsub.f32 %v2160_v15, %v1109_v54  ;;  %v1117_v14 = vrot.slane %v1116_v55, 1  ;;  %v2974_v16 = vpop.f32.mrb[27].mxu1 }
 0x25a   : > { %2332 = vpow2.f32 %v1182_v53  ;;  %v1124_v17 = vrot.slane %v1123_v8, 2  ;;  %v1131_v19 = vrot.slane %v1130_v10, 4  ;;  %v1138_v20 = vsel %vm1091_vm9, %v2972_v13, -inf }
 0x25b   : > { %v1184_v21 = vmul.f32 1.442695, %v1166_v9  ;;  %v1186_v23 = vmul.f32 1.442695, %v1167_v12  ;;  %v1118_v24 = vmax.f32 %v1116_v55, %v1117_v14  ;;  %v1137_v25 = vsel %vm1091_vm9, %v2974_v16, -inf }
 0x25c   : > { %v1125_v27 = vmax.f32 %v1123_v8, %v1124_v17  ;;  %v1132_v28 = vmax.f32 %v1130_v10, %v1131_v19  ;;  %v1139_v29 = vmax.f32 %v1137_v25, %v1138_v20  ;;  %v2980_v18 = vpop.f32.mrb[28].mxu1 }
 0x25d   : > { %2334 = vpow2.f32 %v1184_v21  ;;  %v1168_v15 = vsub.f32 %v1032_v26, %v1118_v24  ;;  %v1169_v30 = vsub.f32 %v2951_v22, %v1118_v24  ;;  %v1147_v32 = vsel %vm1091_vm9, %v2980_v18, -inf  ;;  %v2985_v33 = vpop.f32.mrb[29].mxu1 }
 0x25e   : > { %2336 = vpow2.f32 %v1186_v23  ;;  %v1126_v34 = vrot.slane %v1125_v27, 1  ;;  %v1133_v35 = vrot.slane %v1132_v28, 2  ;;  %v1140_v37 = vrot.slane %v1139_v29, 4 }
 0x25f   : > { %v1188_v38 = vmul.f32 1.442695, %v1168_v15  ;;  %v1190_v39 = vmul.f32 1.442695, %v1169_v30  ;;  %v1146_v40 = vsel %vm1091_vm9, %v2985_v33, -inf }
 0x260   : > { %v1127_v41 = vmax.f32 %v1125_v27, %v1126_v34  ;;  %v1134_v44 = vmax.f32 %v1132_v28, %v1133_v35  ;;  %v1141_v45 = vmax.f32 %v1139_v29, %v1140_v37  ;;  %v1148_v26 = vmax.f32 %v1146_v40, %v1147_v32  ;;  %v2989_v46 = vpop.f32.mrb[30].mxu1 }
 0x261   : > { %2338 = vpow2.f32 %v1188_v38  ;;  %v1156_v22 = vsel %vm1091_vm9, %v2989_v46, -inf  ;;  %v2993_v47 = vpop.f32.mrb[31].mxu1 }
 0x262   : > { %2340 = vpow2.f32 %v1190_v39  ;;  %v1170_v49 = vsub.f32 %v2960_v36, %v1127_v41  ;;  %v1171_v50 = vsub.f32 %v2956_v31, %v1127_v41  ;;  %v1135_v51 = vrot.slane %v1134_v44, 1 }
 0x263   : > { %v2331_v52 = vpop.eup %2330  ;;  %v1142_v53 = vrot.slane %v1141_v45, 2  ;;  %v1149_v54 = vrot.slane %v1148_v26, 4  ;;  %v1155_v55 = vsel %vm1091_vm9, %v2993_v47, -inf }
 0x264   : > { %v2333_v8 = vpop.eup %2332  ;;  %v1212_v10 = vsel %vm1091_vm9, %v2331_v52, 0.0  ;;  %v1192_v9 = vmul.f32 1.442695, %v1170_v49  ;;  %v1194_v12 = vmul.f32 1.442695, %v1171_v50  ;;  %v1136_v14 = vmax.f32 %v1134_v44, %v1135_v51  ;;  %2181 = vmatprep.mubr.msk.f32.mxu0 %vm1091_vm9, %v2331_v52 }
 0x265   : > { %v1213_v17 = vsel %vm1091_vm9, %v2333_v8, 0.0  ;;  %v1143_v36 = vmax.f32 %v1141_v45, %v1142_v53  ;;  %v1150_v19 = vmax.f32 %v1148_v26, %v1149_v54  ;;  %v1157_v31 = vmax.f32 %v1155_v55, %v1156_v22  ;;  %2182 = vmatmul.mubr.msk.f32.vlgmr.msra.gmra.mrb[18].mxu0 %vm1091_vm9, %v2333_v8 }
 0x266   : > { %v1214_v20 = vadd.f32 %v1213_v17, %v1212_v10  ;;  %2342 = vpow2.f32 %v1192_v9  ;;  %v1172_v21 = vsub.f32 %v2966_v48, %v1136_v14  ;;  %v1173_v23 = vsub.f32 %v2964_v43, %v1136_v14 }
 0x267   : > { %v2335_v24 = vpop.eup %2334  ;;  %2344 = vpow2.f32 %v1194_v12  ;;  %v1144_v25 = vrot.slane %v1143_v36, 1  ;;  %v1151_v27 = vrot.slane %v1150_v19, 2  ;;  %v1158_v28 = vrot.slane %v1157_v31, 4 }
 0x268   : > { %v2337_v29 = vpop.eup %2336  ;;  %v1215_v15 = vrot.slane %v1214_v20, 4  ;;  %v1221_v30 = vsel %vm1091_vm9, %v2335_v24, 0.0  ;;  %v1196_v32 = vmul.f32 1.442695, %v1172_v21  ;;  %v1198_v34 = vmul.f32 1.442695, %v1173_v23  ;;  %2184 = vmatprep.mubr.msk.f32.mxu0 %vm1091_vm9, %v2335_v24 }
 0x269   : > { %v1222_v35 = vsel %vm1091_vm9, %v2337_v29, 0.0  ;;  %v1145_v37 = vmax.f32 %v1143_v36, %v1144_v25  ;;  %v1152_v38 = vmax.f32 %v1150_v19, %v1151_v27  ;;  %v1159_v48 = vmax.f32 %v1157_v31, %v1158_v28  ;;  %2185 = vmatmul.mubr.msk.f32.gmra.mrb[20].mxu0 %vm1091_vm9, %v2337_v29 }
 0x26a   : > { %v1216_v43 = vadd.f32 %v1215_v15, %v1214_v20  ;;  %v1223_v39 = vadd.f32 %v1222_v35, %v1221_v30  ;;  %2346 = vpow2.f32 %v1196_v32 }
 0x26b   : > { %v2339_v40 = vpop.eup %2338  ;;  %2348 = vpow2.f32 %v1198_v34  ;;  %v1174_v41 = vsub.f32 %v2974_v16, %v1145_v37  ;;  %v1175_v44 = vsub.f32 %v2972_v13, %v1145_v37  ;;  %v1153_v45 = vrot.slane %v1152_v38, 1 }
 0x26c   : > { %v2341_v26 = vpop.eup %2340  ;;  %v1217_v22 = vrot.slane %v1216_v43, 2  ;;  %v1224_v49 = vrot.slane %v1223_v39, 4  ;;  %v1230_v50 = vsel %vm1091_vm9, %v2339_v40, 0.0  ;;  %v1160_v51 = vrot.slane %v1159_v48, 2  ;;  %2187 = vmatprep.mubr.msk.f32.mxu0 %vm1091_vm9, %v2339_v40 }
 0x26d   : > { %v1231_v52 = vsel %vm1091_vm9, %v2341_v26, 0.0  ;;  %v1200_v53 = vmul.f32 1.442695, %v1174_v41  ;;  %v1202_v54 = vmul.f32 1.442695, %v1175_v44  ;;  %v1154_v55 = vmax.f32 %v1152_v38, %v1153_v45  ;;  %2188 = vmatmul.mubr.msk.f32.gmra.mrb[22].mxu0 %vm1091_vm9, %v2341_v26 }
 0x26e   : > { %v1218_v8 = vadd.f32 %v1217_v22, %v1216_v43  ;;  %v1225_v16 = vadd.f32 %v1224_v49, %v1223_v39  ;;  %v1232_v10 = vadd.f32 %v1231_v52, %v1230_v50  ;;  %v1161_v13 = vmax.f32 %v1159_v48, %v1160_v51 }
 0x26f   : > { %2350 = vpow2.f32 %v1200_v53  ;;  %v1176_v9 = vsub.f32 %v2985_v33, %v1154_v55  ;;  %v1177_v12 = vsub.f32 %v2980_v18, %v1154_v55 }
 0x270   : > { %v2343_v14 = vpop.eup %2342  ;;  %v1219_v17 = vrot.slane %v1218_v8, 1  ;;  %v1226_v36 = vrot.slane %v1225_v16, 2  ;;  %v1233_v19 = vrot.slane %v1232_v10, 4  ;;  %2352 = vpow2.f32 %v1202_v54 }
 0x271   : > { %v2345_v31 = vpop.eup %2344  ;;  %v1239_v20 = vsel %vm1091_vm9, %v2343_v14, 0.0  ;;  %v1204_v21 = vmul.f32 1.442695, %v1176_v9  ;;  %v1206_v23 = vmul.f32 1.442695, %v1177_v12  ;;  %v1162_v24 = vrot.slane %v1161_v13, 1  ;;  %2190 = vmatprep.mubr.msk.f32.mxu0 %vm1091_vm9, %v2343_v14 }
 0x272   : > { %v1227_v25 = vadd.f32 %v1226_v36, %v1225_v16  ;;  %v1234_v27 = vadd.f32 %v1233_v19, %v1232_v10  ;;  %v1240_v28 = vsel %vm1091_vm9, %v2345_v31, 0.0  ;;  %2191 = vmatmul.mubr.msk.f32.gmra.mrb[24].mxu0 %vm1091_vm9, %v2345_v31  ;;  %v1220_v18 = vadd.f32 %v1219_v17, %v1218_v8 }
 0x273   : > { %v1241_v33 = vadd.f32 %v1240_v28, %v1239_v20  ;;  %2354 = vpow2.f32 %v1204_v21  ;;  %v1163_v29 = vmax.f32 %v1161_v13, %v1162_v24 }
 0x274   : > { %v2347_v15 = vpop.eup %2346  ;;  %v1228_v30 = vrot.slane %v1227_v25, 1  ;;  %v1235_v32 = vrot.slane %v1234_v27, 2  ;;  %2356 = vpow2.f32 %v1206_v23 }
 0x275   : > { %v2349_v34 = vpop.eup %2348  ;;  %v1242_v35 = vrot.slane %v1241_v33, 4  ;;  %v1248_v37 = vsel %vm1091_vm9, %v2347_v15, 0.0  ;;  %v1178_v38 = vsub.f32 %v2993_v47, %v1163_v29  ;;  %2193 = vmatprep.mubr.msk.f32.mxu0 %vm1091_vm9, %v2347_v15  ;;  %v1179_v40 = vsub.f32 %v2989_v46, %v1163_v29 }
 0x276   : > { %v1229_v48 = vadd.f32 %v1228_v30, %v1227_v25  ;;  %v1236_v43 = vadd.f32 %v1235_v32, %v1234_v27  ;;  %v1249_v39 = vsel %vm1091_vm9, %v2349_v34, 0.0  ;;  %2194 = vmatmul.mubr.msk.f32.gmra.mrb[26].mxu0 %vm1091_vm9, %v2349_v34  ;;  %2358 = vrcp.f32 %v1220_v18 }
 0x277   : > { %v1243_v41 = vadd.f32 %v1242_v35, %v1241_v33  ;;  %v1250_v44 = vadd.f32 %v1249_v39, %v1248_v37  ;;  %v1208_v45 = vmul.f32 1.442695, %v1178_v38  ;;  %v1210_v22 = vmul.f32 1.442695, %v1179_v40 }
 0x278   : > { %2360 = vrcp.f32 %v1229_v48  ;;  %v1237_v26 = vrot.slane %v1236_v43, 1 }
 0x279   : > { %v2351_v49 = vpop.eup %2350  ;;  %v1244_v50 = vrot.slane %v1243_v41, 2  ;;  %v1251_v47 = vrot.slane %v1250_v44, 4  ;;  %2362 = vpow2.f32 %v1208_v45 }
 0x27a   : > { %v2353_v51 = vpop.eup %2352  ;;  %v1238_v52 = vadd.f32 %v1237_v26, %v1236_v43  ;;  %v1257_v53 = vsel %vm1091_vm9, %v2351_v49, 0.0  ;;  %2364 = vpow2.f32 %v1210_v22  ;;  %2196 = vmatprep.mubr.msk.f32.mxu0 %vm1091_vm9, %v2351_v49 }
 0x27b   : > { %v1245_v46 = vadd.f32 %v1244_v50, %v1243_v41  ;;  %v1252_v54 = vadd.f32 %v1251_v47, %v1250_v44  ;;  %v1258_v55 = vsel %vm1091_vm9, %v2353_v51, 0.0  ;;  %2197 = vmatmul.mubr.msk.f32.gmra.mrb[28].mxu0 %vm1091_vm9, %v2353_v51 }
 0x27c   : > { %2366 = vrcp.f32 %v1238_v52  ;;  %v1259_v8 = vadd.f32 %v1258_v55, %v1257_v53 }
 0x27d   : > { %v2355_v16 = vpop.eup %2354  ;;  %v1246_v10 = vrot.slane %v1245_v46, 1  ;;  %v1253_v13 = vrot.slane %v1252_v54, 2 }
 0x27e   : > { %v1260_v9 = vrot.slane %v1259_v8, 4  ;;  %v1266_v12 = vsel %vm1091_vm9, %v2355_v16, 0.0  ;;  %2199 = vmatprep.mubr.msk.f32.mxu0 %vm1091_vm9, %v2355_v16  ;;  %v2357_v14 = vpop.eup %2356 }
 0x27f   : > { %v1247_v17 = vadd.f32 %v1246_v10, %v1245_v46  ;;  %v1254_v36 = vadd.f32 %v1253_v13, %v1252_v54  ;;  %v1267_v31 = vsel %vm1091_vm9, %v2357_v14, 0.0  ;;  %2200 = vmatmul.mubr.msk.f32.gmra.mrb[30].mxu0 %vm1091_vm9, %v2357_v14  ;;  %v1685_v13 = vld [vmem:[#allocation7] sm:$0xff] }
 0x280   : > { %v1261_v19 = vadd.f32 %v1260_v9, %v1259_v8  ;;  %v2359_v20 = vpop.eup %2358  ;;  %v1268_v23 = vadd.f32 %v1267_v31, %v1266_v12  ;;  %v1686_v9 = vld [vmem:[#allocation7 + $0x8] sm:$0xff]  ;;  %v1687_v12 = vld [vmem:[#allocation7 + $0x10] sm:$0xff] }
 0x281   : > { %2368 = vrcp.f32 %v1247_v17  ;;  %v1255_v21 = vrot.slane %v1254_v36, 1  ;;  %v2252_v14 = vpack.c.bf16 %v1686_v9, %v1685_v13  ;;  %v1688_v17 = vld [vmem:[#allocation7 + $0x18] sm:$0xff] }
 0x282   : > { %v2361_v24 = vpop.eup %2360  ;;  %v1262_v25 = vrot.slane %v1261_v19, 2  ;;  %v1269_v18 = vrot.slane %v1268_v23, 4 }
 0x283   : > { %v2363_v27 = vpop.eup %2362  ;;  %v1256_v28 = vadd.f32 %v1255_v21, %v1254_v36  ;;  %v1582_v33 = vsel %vm696_vm1, %v2361_v24, %v2359_v20  ;;  %2253 = vmatpush3.bf16.msra.mxu0 %v2252_v14  ;;  %v2255_v36 = vpack.c.bf16 %v1688_v17, %v1687_v12 }
 0x284   : > { %v2365_v29 = vpop.eup %2364  ;;  %v1263_v15 = vadd.f32 %v1262_v25, %v1261_v19  ;;  %v1275_v30 = vsel %vm1091_vm9, %v2363_v27, 0.0  ;;  %2202 = vmatprep.mubr.msk.f32.mxu0 %vm1091_vm9, %v2363_v27  ;;  %v1270_v32 = vadd.f32 %v1269_v18, %v1268_v23  ;;  %2254 = vmatprep.subr.bf16.mxu0 %v2541_v11 }
 0x285   : > { %2370 = vrcp.f32 %v1256_v28  ;;  %v1276_v34 = vsel %vm1091_vm9, %v2365_v29, 0.0  ;;  %2203 = vmatmul.mubr.msk.f32.gmra.mrb[32].mxu0 %vm1091_vm9, %v2365_v29 }
 0x286   : > { %v2367_v35 = vpop.eup %2366  ;;  %v1264_v37 = vrot.slane %v1263_v15, 1  ;;  %v1277_v38 = vadd.f32 %v1276_v34, %v1275_v30  ;;  %2218 = vmatprep.mubr.msk.f32.mxu0 %vm2542_vm8, %v2543_v42  ;;  %v1271_v48 = vrot.slane %v1270_v32, 2 }
 0x287   : > { %v1583_v43 = vsel %vm699_vm2, %v2367_v35, %v1582_v33  ;;  %2256 = vmatpush3.bf16.msra.mxu0 %v2255_v36 }
 0x288   : > { %v1265_v39 = vadd.f32 %v1264_v37, %v1263_v15  ;;  %v1278_v40 = vrot.slane %v1277_v38, 4  ;;  %v1272_v41 = vadd.f32 %v1271_v48, %v1270_v32 }
 0x28a   : > { %2372 = vrcp.f32 %v1265_v39  ;;  %v1279_v44 = vadd.f32 %v1278_v40, %v1277_v38  ;;  %v1273_v26 = vrot.slane %v1272_v41, 1 }
 0x28b   : > { %v2369_v45 = vpop.eup %2368 }
 0x28c   : > { %v1280_v22 = vrot.slane %v1279_v44, 2  ;;  %v1584_v49 = vsel %vm702_vm3, %v2369_v45, %v1583_v43  ;;  %v1274_v50 = vadd.f32 %v1273_v26, %v1272_v41 }
 0x28e   : > { %v1281_v47 = vadd.f32 %v1280_v22, %v1279_v44  ;;  %2374 = vrcp.f32 %v1274_v50 }
 0x28f   : > { %v2371_v51 = vpop.eup %2370 }
 0x290   : > { %v1282_v52 = vrot.slane %v1281_v47, 1  ;;  %v1585_v42 = vsel %vm705_vm4, %v2371_v51, %v1584_v49 }
 0x292   : > { %v1283_v53 = vadd.f32 %v1282_v52, %v1281_v47 }
 0x294   : > { %v2373_v46 = vpop.eup %2372  ;;  %2376 = vrcp.f32 %v1283_v53 }
 0x295   : > { %v1586_v54 = vsel %vm708_vm5, %v2373_v46, %v1585_v42 }
 0x298   : > { %v2375_v55 = vpop.eup %2374 }
 0x299   : > { %v1587_v8 = vsel %vm711_vm6, %v2375_v55, %v1586_v54 }
 0x29e   : > { %v2377_v16 = vpop.eup %2376 }
 0x29f   : > { %v1588_v10 = vsel %vm714_vm7, %v2377_v16, %v1587_v8 }
 0x2a0   : > { %2208 = vmatmul.mubr.msk.f32.vlgmr.msra.gmra.mrb[32].mxu1 %vm1091_vm9, %v1588_v10 }
 0x338   : > { %v2183_v19 = vpop.f32.mrb[18].mxu0 }
 0x339   : > { %v1487_v31 = vmul.f32 %v2183_v19, %v2911_v56  ;;  %v1407_v20 = vpop.f32.mrb[19].mxu0 }
 0x33a   : > { %v1486_v21 = vmul.f32 %v1407_v20, %v2913_v57 }
 0x33b   : > { %v1503_v23 = vsel %vm352_vm0, %v1487_v31, 0.0 }
 0x33c   : > { %v1502_v24 = vsel %vm352_vm0, %v1486_v21, 0.0  ;;  %v2186_v25 = vpop.f32.mrb[20].mxu0 }
 0x33d   : > { %v1504_v27 = vadd.f32 %v1503_v23, %v1502_v24  ;;  %v1489_v28 = vmul.f32 %v2186_v25, %v2915_v58  ;;  %v1417_v18 = vpop.f32.mrb[21].mxu0 }
 0x33e   : > { %v1488_v33 = vmul.f32 %v1417_v18, %v2917_v59 }
 0x33f   : > { %v1512_v11 = vsel %vm352_vm0, %v1489_v28, 0.0 }
 0x340   : > { %v1511_v29 = vsel %vm352_vm0, %v1488_v33, 0.0  ;;  %v2189_v15 = vpop.f32.mrb[22].mxu0 }
 0x341   : > { %v1513_v56 = vadd.f32 %v1512_v11, %v1511_v29  ;;  %v1491_v30 = vmul.f32 %v2189_v15, %v2919_v60  ;;  %v1427_v57 = vpop.f32.mrb[23].mxu0 }
 0x342   : > { %v1490_v32 = vmul.f32 %v1427_v57, %v2921_v61 }
 0x343   : > { %v1521_v34 = vsel %vm352_vm0, %v1491_v30, 0.0  ;;  %v1514_v12 = vrot.slane %v1513_v56, 4 }
 0x344   : > { %v1520_v35 = vsel %vm352_vm0, %v1490_v32, 0.0 }
 0x345   : > { %v1522_v37 = vadd.f32 %v1521_v34, %v1520_v35  ;;  %v2192_v58 = vpop.f32.mrb[24].mxu0  ;;  %v1515_v21 = vadd.f32 %v1514_v12, %v1513_v56 }
 0x346   : > { %v1493_v38 = vmul.f32 %v2192_v58, %v2923_v62  ;;  %v1437_v59 = vpop.f32.mrb[25].mxu0 }
 0x347   : > { %v1492_v48 = vmul.f32 %v1437_v59, %v2925_v63  ;;  %v1523_v14 = vrot.slane %v1522_v37, 4  ;;  %v1516_v33 = vrot.slane %v1515_v21, 2 }
 0x348   : > { %v1530_v43 = vsel %vm352_vm0, %v1493_v38, 0.0 }
 0x349   : > { %v1529_v39 = vsel %vm352_vm0, %v1492_v48, 0.0  ;;  %v2195_v40 = vpop.f32.mrb[26].mxu0  ;;  %v1524_v23 = vadd.f32 %v1523_v14, %v1522_v37  ;;  %v1517_v35 = vadd.f32 %v1516_v33, %v1515_v21 }
 0x34a   : > { %v1531_v60 = vadd.f32 %v1530_v43, %v1529_v39  ;;  %v1495_v41 = vmul.f32 %v2195_v40, %v2927_v0  ;;  %v1447_v61 = vpop.f32.mrb[27].mxu0 }
 0x34b   : > { %v1494_v44 = vmul.f32 %v1447_v61, %v2929_v1  ;;  %v1525_v11 = vrot.slane %v1524_v23, 2  ;;  %v1518_v43 = vrot.slane %v1517_v35, 1 }
 0x34c   : > { %v1539_v45 = vsel %vm352_vm0, %v1495_v41, 0.0 }
 0x34d   : > { %v1538_v26 = vsel %vm352_vm0, %v1494_v44, 0.0  ;;  %v1526_v58 = vadd.f32 %v1525_v11, %v1524_v23 }
 0x34e   : > { %v1540_v22 = vadd.f32 %v1539_v45, %v1538_v26  ;;  %v2198_v62 = vpop.f32.mrb[28].mxu0  ;;  %v1519_v26 = vadd.f32 %v1518_v43, %v1517_v35 }
 0x34f   : > { %v1497_v49 = vmul.f32 %v2198_v62, %v2931_v2  ;;  %v1457_v63 = vpop.f32.mrb[29].mxu0  ;;  %v1527_v39 = vrot.slane %v1526_v58, 1 }
 0x350   : > { %v1496_v50 = vmul.f32 %v1457_v63, %v2933_v3  ;;  %v1541_v17 = vrot.slane %v1540_v22, 4 }
 0x351   : > { %v1548_v47 = vsel %vm352_vm0, %v1497_v49, 0.0 }
 0x352   : > { %v1547_v51 = vsel %vm352_vm0, %v1496_v50, 0.0  ;;  %v2201_v0 = vpop.f32.mrb[30].mxu0  ;;  %v1542_v24 = vadd.f32 %v1541_v17, %v1540_v22  ;;  %v1528_v22 = vadd.f32 %v1527_v39, %v1526_v58 }
 0x353   : > { %v1549_v52 = vadd.f32 %v1548_v47, %v1547_v51  ;;  %v1499_v42 = vmul.f32 %v2201_v0, %v2935_v4  ;;  %v1467_v1 = vpop.f32.mrb[31].mxu0  ;;  %v1505_v4 = vrot.slane %v1504_v27, 4 }
 0x354   : > { %v1498_v53 = vmul.f32 %v1467_v1, %v2937_v5  ;;  %v1532_v5 = vrot.slane %v1531_v60, 4  ;;  %v1543_v15 = vrot.slane %v1542_v24, 2 }
 0x355   : > { %v1557_v46 = vsel %vm352_vm0, %v1499_v42, 0.0  ;;  %v1550_v36 = vrot.slane %v1549_v52, 4  ;;  %v1506_v20 = vadd.f32 %v1505_v4, %v1504_v27 }
 0x356   : > { %v1556_v54 = vsel %vm352_vm0, %v1498_v53, 0.0  ;;  %v1544_v27 = vadd.f32 %v1543_v15, %v1542_v24 }
 0x357   : > { %v1558_v55 = vadd.f32 %v1557_v46, %v1556_v54  ;;  %v1551_v25 = vadd.f32 %v1550_v36, %v1549_v52  ;;  %v1507_v18 = vrot.slane %v1506_v20, 2 }
 0x358   : > { %v2204_v2 = vpop.f32.mrb[32].mxu0 }
 0x359   : > { %v1501_v8 = vmul.f32 %v2204_v2, %v2939_v6  ;;  %v1477_v3 = vpop.f32.mrb[33].mxu0  ;;  %v1559_v19 = vrot.slane %v1558_v55, 4  ;;  %v1533_v6 = vadd.f32 %v1532_v5, %v1531_v60  ;;  %v1552_v30 = vrot.slane %v1551_v25, 2 }
 0x35a   : > { %v1500_v16 = vmul.f32 %v1477_v3, %v2941_v7  ;;  %v1508_v34 = vadd.f32 %v1507_v18, %v1506_v20  ;;  %v1545_v60 = vrot.slane %v1544_v27, 1 }
 0x35b   : > { %v1566_v10 = vsel %vm352_vm0, %v1501_v8, 0.0  ;;  %v1560_v7 = vadd.f32 %v1559_v19, %v1558_v55  ;;  %v1534_v29 = vrot.slane %v1533_v6, 2  ;;  %v1553_v56 = vadd.f32 %v1552_v30, %v1551_v25 }
 0x35c   : > { %v1565_v13 = vsel %vm352_vm0, %v1500_v16, 0.0  ;;  %v1509_v48 = vrot.slane %v1508_v34, 1  ;;  %v1546_v49 = vadd.f32 %v1545_v60, %v1544_v27 }
 0x35d   : > { %v1567_v9 = vadd.f32 %v1566_v10, %v1565_v13  ;;  %v1561_v57 = vrot.slane %v1560_v7, 2  ;;  %v1535_v38 = vadd.f32 %v1534_v29, %v1533_v6  ;;  %v1554_v41 = vrot.slane %v1553_v56, 1 }
 0x35e   : > { %v1510_v45 = vadd.f32 %v1509_v48, %v1508_v34 }
 0x35f   : > { %v1568_v31 = vrot.slane %v1567_v9, 4  ;;  %v1562_v37 = vadd.f32 %v1561_v57, %v1560_v7  ;;  %v1536_v40 = vrot.slane %v1535_v38, 1  ;;  %v1555_v63 = vadd.f32 %v1554_v41, %v1553_v56 }
 0x361   : > { %v1569_v28 = vadd.f32 %v1568_v31, %v1567_v9  ;;  %v1563_v61 = vrot.slane %v1562_v37, 1  ;;  %v1537_v62 = vadd.f32 %v1536_v40, %v1535_v38 }
 0x363   : > { %v1570_v32 = vrot.slane %v1569_v28, 2  ;;  %v1564_v50 = vadd.f32 %v1563_v61, %v1562_v37 }
 0x365   : > { %v1571_v59 = vadd.f32 %v1570_v32, %v1569_v28  ;;  %v1975_v28 = vld [vmem:[%s3146_s4] ss:$0 sm:$0xff] }
 0x367   : > { %v1572_v44 = vrot.slane %v1571_v59, 1 }
 0x369   : > { %v1573_v47 = vadd.f32 %v1572_v44, %v1571_v59 }
 0x373   : > { %v1657_v51 = vpop.f32.mrb[32].mxu1 }
 0x374   : > { %v1662_v52 = vrot.slane %v1657_v51, 1  ;;  %v1663_v0 = vrot.slane %v1657_v51, 2  ;;  %v1664_v42 = vrot.slane %v1657_v51, 3  ;;  %v1665_v1 = vrot.slane %v1657_v51, 4  ;;  %v2209_v53 = vpop.f32.mrb[33].mxu1 }
 0x375   : > { %v1666_v46 = vrot.slane %v1657_v51, 5  ;;  %v1677_v54 = vmul.f32 %v1657_v51, %v1510_v45  ;;  %v1667_v55 = vrot.slane %v1657_v51, 6  ;;  %v1668_v2 = vrot.slane %v1657_v51, 7 }
 0x376   : > { %v1678_v8 = vmul.f32 %v1662_v52, %v1519_v26  ;;  %v1679_v3 = vmul.f32 %v1663_v0, %v1528_v22  ;;  %v1680_v16 = vmul.f32 %v1664_v42, %v1537_v62  ;;  %v1681_v10 = vmul.f32 %v1665_v1, %v1546_v49 }
 0x377   : > { %v1682_v13 = vmul.f32 %v1666_v46, %v1555_v63  ;;  %v1683_v9 = vmul.f32 %v1667_v55, %v1564_v50  ;;  %v1684_v4 = vmul.f32 %v1668_v2, %v1573_v47 }
 0x378   : > { %v1704_v12 = vrot.slane %v1678_v8, 7  ;;  %v1706_v14 = vrot.slane %v1679_v3, 6  ;;  %v1708_v17 = vrot.slane %v1680_v16, 5  ;;  %v1710_v19 = vrot.slane %v1681_v10, 4 }
 0x379   : > { %v1712_v20 = vrot.slane %v1682_v13, 3  ;;  %v1714_v23 = vrot.slane %v1683_v9, 2  ;;  %v1716_v24 = vrot.slane %v1684_v4, 1 }
 0x37a   : > { %v1705_v5 = vsel %vm696_vm1, %v1704_v12, %v1677_v54 }
 0x37b   : > { %v1707_v36 = vsel %vm699_vm2, %v1706_v14, %v1705_v5 }
 0x37c   : > { %v1709_v31 = vsel %vm702_vm3, %v1708_v17, %v1707_v36 }
 0x37d   : > { %v1711_v21 = vsel %vm705_vm4, %v1710_v19, %v1709_v31 }
 0x37e   : > { %v1713_v6 = vsel %vm708_vm5, %v1712_v20, %v1711_v21 }
 0x37f   : > { %v1715_v25 = vsel %vm711_vm6, %v1714_v23, %v1713_v6 }
 0x380   : > { %v1717_v7 = vsel %vm714_vm7, %v1716_v24, %v1715_v25 }
 0x381   : > { %2219 = vmatmul.mubr.msk.f32.vlgmr.msra.gmra.mrb[34].mxu0 %vm352_vm0, %v1717_v7 }
 0x454   : > { %v1786_v18 = vpop.f32.mrb[34].mxu0 }
 0x455   : > { %v1787_v33 = vadd.f32 %v1975_v28, %v1786_v18  ;;  %v2220_v11 = vpop.f32.mrb[35].mxu0 }
 0x457   : > { %1791 = vst.msk [vmem:[%s326_s23] sm:$0xff] %vm1790_vm10, %v1787_v33 }
 0x458   : > { %2477 = shalt.err (!%p2474_p1)
}
 0x459   : > { %s2478_s20 = scalar_lea.hbm %s3098_s30, 128  ;;  %s2482_s14 = scalar_lea.hbm %s3149_s7, 256 }
 0x45a   : > { %p2479_p13 = scmp.ne.s32.totalorder %s3098_s30, %s2478_s20  ;;  %p2483_p4 = scmp.lt.u32.totalorder %s3098_s30, %s3149_s7 }
 0x45b   : > { %p2484_p5 = scmp.lt.u32.totalorder %s2482_s14, %s2478_s20  ;;  %p2486_p11 = scmp.lt.u32.totalorder %s2478_s20, %s3098_s30 }
 0x45c   : > { %p2480_p6 = pnand %p2479_p13, %p3165_p0 }
 0x45d   : > { %p2485_p8 = por %p2484_p5, %p2483_p4 }
 0x45e   : > { %p2481_p10 = pneg %p2480_p6 }
 0x45f   : > { %p2487_p2 = por %p2486_p11, %p2485_p8 }
 0x461   : > { %p2488_p3 = pnand %p2487_p2, %p2481_p10 }
 0x463   : > { %2491 = shalt.err (!%p2488_p3)
}
 0x464   : > { %2267 = dma.vmem_to_hbm [thread:$0]  (%p3165_p0), %s3100_s22, 128, %s3098_s30, %s1793_s9  }
 0x465 PF: > { %s1818_s18 = sand.u32 1, %s2522_s24   ;;  %p3166_p7 = scmp.ne.s32.totalorder %s3155_s8, 0 }
 0x466   : > { %p3167_p9 = scmp.ge.s32.totalorder %s2534_s27, 2  ;;  %s1819_s19 = scalar_lea.sflag [#allocation4], %s1818_s18 }
 0x468   : > { %p2281_p12 = pnand %p3167_p9, %p3166_p7 }
 0x46a   : > { %2517 = dma.done.wait (!%p2281_p12), %s1819_s19, 128  }
 0x46b   : > { %2519 = vsyncadd (!%p2281_p12), %s1819_s19, 4294967168  ;;  %p21_p1 = scmp.ge.s32.totalorder %s2702_s12, 4   ;;  %s3168_s24 = smov %s2526_s25 }
 0x46c   : > { %s3169_s25 = smov %s2530_s26  ;;  %s3170_s26 = smov %s2718_s17 }
 0x46d   : > { %s3171_s27 = smov %s2702_s12  ;;  %23 = sbr.rel (!%p21_p1) target bundleno = 6 (0x6), region = 101 }
 0x474   :  { %1824 = vsyncpa [#allocation3], 1 }
 0x475   :  { %1826 = vsyncpa [#allocation3 + $0x1], 1 }
 0x476   :  { %1827 = vsyncpa [#allocation6], 1 }
 0x477   :  { %1828 = vsyncpa [#allocation4], 1 }
 0x478   :  { %1830 = vsyncpa [#allocation4 + $0x1], 1 }

// kernel: tpu_custom_call.1
= control target key start
LH: loop header
LB: loop body
LE: loop exit
PB: predicated region body
PF: predicated region fallthrough
CT: control target
= control target key end

     0   :  { %12 = vsyncpa [#allocation3], 0  ;;  %s3142_s0 = inlined_call_operand.hbm [shape: f32[16,16,32], index: 0, kind: input, shape index: {}]   ;;  %s3143_s1 = inlined_call_operand.vmem [shape: f32[32,32], index: 1, kind: input, shape index: {}]   ;;  %s3144_s2 = inlined_call_operand.hbm [shape: f32[2,32,32], index: 2, kind: input, shape index: {}]   ;;  %s3145_s3 = inlined_call_operand.hbm [shape: f32[32,64], index: 3, kind: input, shape index: {}]   ;;  %s3146_s4 = inlined_call_operand.vmem [shape: f32[1,64], index: 4, kind: input, shape index: {}]   ;;  %s3147_s5 = inlined_call_operand.vmem [shape: f32[32,8], index: 5, kind: input, shape index: {}]   ;;  %s3148_s6 = inlined_call_operand.vmem [shape: f32[8,32], index: 6, kind: input, shape index: {}]   ;;  %s3149_s7 = inlined_call_operand.hbm [shape: f32[16,64], index: 7, kind: output, shape index: {}]  }
   0x1   :  { %14 = vsyncpa [#allocation3 + $0x1], 0 }
   0x2   :  { %15 = vsyncpa [#allocation6], 0 }
   0x3   :  { %16 = vsyncpa [#allocation4], 0 }
   0x4   :  { %18 = vsyncpa [#allocation4 + $0x1], 0  ;;  %s2586_s24 = smov 0   ;;  %s2588_s25 = smov 0  }
   0x5   :  { %s2590_s26 = smov 0   ;;  %s2592_s27 = smov 0  }
   0x6 LB: > { %s2607_s28 = sadd.s32 4294967295, %s2534_s27   ;;  %s1895_s29 = sadd.s32 4294967294, %s2534_s27   ;;  %s2534_s27 = sphi %s2592_s27, %s3171_s27   ;;  %s2530_s26 = sphi %s2590_s26, %s3170_s26   ;;  %s2526_s25 = sphi %s2588_s25, %s3169_s25   ;;  %s2522_s24 = sphi %s2586_s24, %s3168_s24  }
   0x7   : > { %p44_p0 = scmp.ne.s32.totalorder %s2526_s25, %s2522_s24  ;;  %p3150_p1 = scmp.eq.s32.totalorder %s2607_s28, 0 }
   0x8   : > { %p200_p3 = scmp.eq.s32.totalorder %s1895_s29, 1  ;;  %p1896_p5 = scmp.ge.s32.totalorder %s2534_s27, 1 }
   0x9   : > { %p2616_p4 = por %p3150_p1, %p44_p0  ;;  %p207_p7 = scmp.lt.s32.totalorder %s2534_s27, 3 }
   0xa   : > { %p2621_p6 = por %p200_p3, %p44_p0  ;;  %s2536_s10 = smov [#allocation5]  }
   0xb   : > { %s3154_s30 = scalar_select %p2616_p4, 1, 0 }
   0xc   : > { %s3155_s8 = scalar_select %p2621_p6, 1, 0 }
   0xd   : > { %p2626_p8 = pnand %p1896_p5, %p207_p7  ;;  %s222_s11 = sshll.u32 %s2536_s10, 4  ;;  %s2630_s11 = int_to_ptr.vmem [resolvable:$true] %s222_s11 }
   0xe   : > { %s2537_s13 = smov [#allocation7]   ;;  %s2378_s17 = scalar_lea.hbm %s3144_s2, 1024 }
   0xf   : > { %p2269_p9 = pneg %p2626_p8  ;;  %s235_s14 = sshll.u32 %s2537_s13, 4  ;;  %s2641_s14 = int_to_ptr.vmem [resolvable:$true] %s235_s14 }
  0x10   : > { %p2379_p12 = scmp.ne.s32.totalorder %s3144_s2, %s2378_s17  ;;  %p2385_p5 = scmp.lt.u32.totalorder %s2378_s17, %s3144_s2 }
  0x11   : > { %p2637_p11 = pnand %p2269_p9, %p3150_p1 }
  0x13   : > { %p2380_p13 = pneg %p2637_p11 }
  0x15   : > { %p2381_p0 = pnand %p2380_p13, %p2379_p12 }
  0x17   : > { %p2382_p3 = pneg %p2381_p0 }
  0x19   : > { %p2387_p7 = pnand %p2385_p5, %p2382_p3 }
  0x1b   : > { %2390 = shalt.err (!%p2387_p7)
}
  0x1c   : > { %s2391_s22 = scalar_lea.vmem %s2630_s11, 1024  ;;  %p2399_p2 = scmp.lt.s32.totalorder %s2630_s11, %s2630_s11 }
  0x1d   : > { %p2392_p9 = scmp.ne.s32.totalorder %s2630_s11, %s2391_s22  ;;  %p2400_p12 = scmp.lt.s32.totalorder %s2391_s22, %s2391_s22 }
  0x1f   : > { %p2394_p10 = pnand %p2392_p9, %p2380_p13  ;;  %p2401_p0 = por %p2400_p12, %p2399_p2 }
  0x21   : > { %p2395_p1 = pneg %p2394_p10 }
  0x23   : > { %p2402_p6 = pnand %p2401_p0, %p2395_p1 }
  0x25   : > { %2405 = shalt.err (!%p2402_p6)
}
  0x26   : > { %s3151_s23 = smov 128   ;;  %s2539_s29 = smov 8  }
  0x27   : > { %2272 = dma.hbm_to_vmem [thread:$0]  (!%p2637_p11), %s3144_s2, 1024, %s2630_s11, [#allocation6], %s3151_s23, %s3151_s23, %s2539_s29  }
  0x28   : > { %s2406_s17 = scalar_lea.hbm %s3145_s3, 512 }
  0x29   : > { %p2407_p1 = scmp.ne.s32.totalorder %s3145_s3, %s2406_s17  ;;  %p2413_p10 = scmp.lt.u32.totalorder %s2406_s17, %s3145_s3 }
  0x2b   : > { %p2409_p2 = pnand %p2407_p1, %p2380_p13 }
  0x2d   : > { %p2410_p6 = pneg %p2409_p2 }
  0x2f   : > { %p2415_p3 = pnand %p2413_p10, %p2410_p6 }
  0x31   : > { %2418 = shalt.err (!%p2415_p3)
}
  0x32   : > { %s2419_s11 = scalar_lea.vmem %s2641_s14, 512  ;;  %p2427_p12 = scmp.lt.s32.totalorder %s2641_s14, %s2641_s14 }
  0x33   : > { %p2420_p5 = scmp.ne.s32.totalorder %s2641_s14, %s2419_s11  ;;  %p2428_p0 = scmp.lt.s32.totalorder %s2419_s11, %s2419_s11 }
  0x35   : > { %p2422_p7 = pnand %p2420_p5, %p2380_p13  ;;  %p2429_p1 = por %p2428_p0, %p2427_p12 }
  0x37   : > { %p2423_p9 = pneg %p2422_p7 }
  0x39   : > { %p2430_p2 = pnand %p2429_p1, %p2423_p9 }
  0x3b   : > { %2433 = shalt.err (!%p2430_p2)
}
  0x3c   : > { %2275 = dma.hbm_to_vmem [thread:$0]  (!%p2637_p11), %s3145_s3, 512, %s2641_s14, [#allocation6], %s3151_s23, %s3151_s23, %s2539_s29  }
  0x3d   : > { %s2702_s12 = sadd.s32 1, %s2534_s27   ;;  %s31_s13 = sadd.s32 1, %s2530_s26 }
  0x3e   : > { %s28_s15 = ssub.s32 %s2534_s27, %s2702_s12  ;;  %p38_p13 = scmp.ne.s32.totalorder %s2530_s26, %s2526_s25 }
  0x3f   : > { %p29_p6 = scmp.eq.s32.totalorder %s28_s15, 0  ;;  %p39_p10 = scmp.eq.s32.totalorder %s2534_s27, 0 }
  0x40   : > { %p3158_p3 = scmp.eq.s32.totalorder %s2607_s28, 1  ;;  %p2286_p7 = scmp.lt.s32.totalorder %s2534_s27, 2 }
  0x41   : > { %s2718_s17 = scalar_select %p29_p6, %s2530_s26, %s31_s13  }
  0x42   : > { %p2712_p5 = por %p3158_p3, %p38_p13  ;;  %p40_p9 = por %p39_p10, %p38_p13 }
  0x43   : > { %s258_s18 = sand.u32 1, %s2530_s26   ;;  %s1982_s14 = sshll.u32 %s2534_s27, 11 }
  0x44   : > { %s3159_s16 = scalar_select %p2712_p5, 1, 0 }
  0x45   : > { %s1900_s19 = sshll.u32 %s258_s18, 7  ;;  %s2725_s11 = scalar_lea.hbm %s3142_s0, %s1982_s14 }
  0x46   : > { %s262_s22 = scalar_lea.vmem [#allocation2], %s1900_s19  ;;  %p2729_p11 = pnand %p2286_p7, %p40_p9 }
  0x47   : > { %s270_s10 = sshll.u32 %s262_s22, 4  ;;  %s2733_s15 = scalar_lea.sflag [#allocation3], %s258_s18  ;;  %s2727_s10 = int_to_ptr.vmem [resolvable:$true] %s270_s10 }
  0x48   : > { %s2434_s23 = scalar_lea.hbm %s2725_s11, 2048  ;;  %p2436_p0 = pneg %p2729_p11 }
  0x49   : > { %p2435_p12 = scmp.ne.s32.totalorder %s2725_s11, %s2434_s23  ;;  %s2439_s20 = scalar_lea.hbm %s3142_s0, 4096 }
  0x4a   : > { %p2440_p13 = scmp.lt.u32.totalorder %s2725_s11, %s3142_s0  ;;  %p2441_p6 = scmp.lt.u32.totalorder %s2439_s20, %s2434_s23 }
  0x4b   : > { %p2437_p1 = pnand %p2436_p0, %p2435_p12  ;;  %p2443_p3 = scmp.lt.u32.totalorder %s2434_s23, %s2725_s11 }
  0x4c   : > { %p2442_p10 = por %p2441_p6, %p2440_p13 }
  0x4d   : > { %p2438_p2 = pneg %p2437_p1 }
  0x4e   : > { %p2444_p7 = por %p2443_p3, %p2442_p10 }
  0x50   : > { %p2445_p9 = pnand %p2444_p7, %p2438_p2 }
  0x52   : > { %2448 = shalt.err (!%p2445_p9)
}
  0x53   : > { %s2449_s18 = scalar_lea.vmem %s2727_s10, 2048  ;;  %s2540_s19 = smov [#allocation2]  }
  0x54   : > { %p2450_p12 = scmp.ne.s32.totalorder %s2727_s10, %s2449_s18  ;;  %s2454_s14 = sshll.u32 %s2540_s19, 4  ;;  %s2455_s14 = int_to_ptr.vmem [resolvable:$false] %s2454_s14 }
  0x55   : > { %s2456_s21 = scalar_lea.vmem %s2455_s14, 4096  ;;  %p2457_p4 = scmp.lt.s32.totalorder %s2727_s10, %s2455_s14 }
  0x56   : > { %p2452_p1 = pnand %p2450_p12, %p2436_p0  ;;  %p2458_p13 = scmp.lt.s32.totalorder %s2456_s21, %s2449_s18 }
  0x58   : > { %p2453_p5 = pneg %p2452_p1  ;;  %p2459_p6 = por %p2458_p13, %p2457_p4 }
  0x5a   : > { %p2460_p10 = pnand %p2459_p6, %p2453_p5 }
  0x5c   : > { %2463 = shalt.err (!%p2460_p10)
}
  0x5d   : > { %s3161_s23 = smov 128   ;;  %282 = sbr.rel (%p2626_p8) target bundleno = 1125 (0x465), region = 48 }
  0x5e   : > { %2279 = dma.hbm_to_vmem [thread:$0]  (!%p2729_p11), %s2725_s11, 2048, %s2727_s10, %s2733_s15, %s3161_s23, %s3161_s23, %s2539_s29  }
  0x5f   : > { %s2767_s20 = sand.u32 (!%p2626_p8), 1, %s2526_s25   ;;  %p3162_p4 = scmp.ne.s32.totalorder (!%p2626_p8), %s3154_s30, 0 }
  0x60   : > { %s1905_s22 = sshll.u32 (!%p2626_p8), %s2767_s20, 7  ;;  %s285_s18 = scalar_lea.sflag (!%p2626_p8), [#allocation3], %s2767_s20 }
  0x61   : > { %s2771_s19 = scalar_lea.vmem (!%p2626_p8), [#allocation2], %s1905_s22 }
  0x64   : > { %2509 = dma.done.wait (%p3162_p4), %s285_s18, 2048  }
  0x65   : > { %2511 = vsyncadd (%p3162_p4), %s285_s18, 4294965248  ;;  %p3163_p5 = scmp.eq.s32.totalorder %s2607_s28, 0 }
  0x67   : > { %2513 = dma.done.wait (%p3163_p5), [#allocation6], 1536   ;;  %p3164_p8 = pmov %p3163_p5 }
  0x68   : > { %vm352_vm0 = vcmask 261120   ;;  %v344_v0 = vld [vmem:[#allocation5] sm:$0xff]  ;;  %v345_v1 = vld [vmem:[#allocation5 + $0x8] sm:$0xff]  ;;  %v346_v2 = vld [vmem:[#allocation5 + $0x10] sm:$0xff]  ;;  %v2541_v11 = vmov 0.0|0.0   ;;  %vm696_vm1 = vcmask 1041409  }
  0x69   : > { %2515 = vsyncadd (%p3164_p8), [#allocation6], 4294965760  ;;  %v2221_v3 = vpack.c.bf16 %v345_v1, %v344_v0  ;;  %v347_v4 = vld [vmem:[#allocation5 + $0x18] sm:$0xff]  ;;  %v328_v5 = vld [vmem:[%s2771_s19] sm:$0xff]  ;;  %vm699_vm2 = vcmask 1042434   ;;  %vm702_vm3 = vcmask 1043459  }
  0x6a   : > { %v2225_v6 = vpack.c.bf16 %v347_v4, %v346_v2  ;;  %2080 = vmatprep.mubr.msk.f32.mxu0 %vm352_vm0, %v328_v5  ;;  %2112 = vmatprep.mubr.msk.f32.mxu1 %vm352_vm0, %v328_v5  ;;  %v691_v7 = vld [vmem:[%s3143_s1] sm:$0xff]  ;;  %v692_v8 = vld [vmem:[%s3143_s1 + $0x8] sm:$0xff]  ;;  %v2795_v12 = vld [vmem:[%s2771_s19 + $0x10] sm:$0xff]  ;;  %vm705_vm4 = vcmask 1044484   ;;  %vm708_vm5 = vcmask 1045509   ;;  %vm711_vm6 = vcmask 1046534  }
  0x6b   : > { %2222 = vmatprep.subr.bf16.mxu0 %v2221_v3  ;;  %v2791_v9 = vld [vmem:[%s2771_s19 + $0x8] sm:$0xff]  ;;  %v2238_v10 = vpack.c.bf16 %v692_v8, %v691_v7  ;;  %v693_v13 = vld [vmem:[%s3143_s1 + $0x10] sm:$0xff]  ;;  %v694_v14 = vld [vmem:[%s3143_s1 + $0x18] sm:$0xff]  ;;  %v695_v20 = vrot.slane %v2795_v12, 7  ;;  %vm714_vm7 = vcmask 1047559   ;;  %vm2542_vm8 = vmmov 0  }
  0x6c   : > { %2224 = vmatpush3.bf16.msra.mxu0 %v2221_v3  ;;  %v2808_v15 = vld [vmem:[%s2771_s19 + $0x18] sm:$0xff]  ;;  %v2241_v16 = vpack.c.bf16 %v694_v14, %v693_v13  ;;  %v2811_v17 = vld [vmem:[%s2771_s19 + $0x20] sm:$0xff]  ;;  %v2819_v18 = vld [vmem:[%s2771_s19 + $0x28] sm:$0xff]  ;;  %v2543_v42 = vmov 0.0   ;;  %v2544_v4 = vmov 1966171168  }
  0x6d   : > { %2226 = vmatprep.subr.bf16.mxu0 %v2225_v6  ;;  %v2822_v19 = vld [vmem:[%s2771_s19 + $0x30] sm:$0xff]  ;;  %v335_v21 = vld [vmem:[%s2771_s19 + $0x38] sm:$0xff]  ;;  %v698_v22 = vrot.slane %v2811_v17, 6  ;;  %v336_v23 = vld [vmem:[%s2771_s19 + $0x40] sm:$0xff]  ;;  %v697_v24 = vsel %vm696_vm1, %v695_v20, %v328_v5  ;;  %v791_v5 = vunpack.c.l.s4 %v2544_v4  ;;  %vm1091_vm9 = vcmask 64512   ;;  %s1908_s13 = sshll.u32 %s2767_s20, 3 }
  0x6e   : > { %v701_v25 = vrot.slane %v2822_v19, 5  ;;  %v337_v26 = vld [vmem:[%s2771_s19 + $0x48] sm:$0xff]  ;;  %v338_v28 = vld [vmem:[%s2771_s19 + $0x50] sm:$0xff]  ;;  %v704_v29 = vrot.slane %v336_v23, 4  ;;  %v339_v31 = vld [vmem:[%s2771_s19 + $0x58] sm:$0xff]  ;;  %s1978_s21 = sshll.u32 %s2607_s28, 7 }
  0x6f   : > { %v700_v27 = vsel %vm699_vm2, %v698_v22, %v697_v24  ;;  %v340_v32 = vld [vmem:[%s2771_s19 + $0x60] sm:$0xff]  ;;  %v707_v33 = vrot.slane %v338_v28, 3  ;;  %v341_v35 = vld [vmem:[%s2771_s19 + $0x68] sm:$0xff]  ;;  %v342_v37 = vld [vmem:[%s2771_s19 + $0x70] sm:$0xff]  ;;  %s326_s23 = scalar_lea.vmem [#allocation8], %s1908_s13  ;;  %vm1790_vm10 = vcmask 523264   ;;  %s3098_s30 = scalar_lea.hbm %s3149_s7, %s1978_s21 }
  0x70   : > { %2228 = vmatpush3.bf16.msra.mxu0 %v2225_v6  ;;  %v703_v30 = vsel %vm702_vm3, %v701_v25, %v700_v27  ;;  %v710_v36 = vrot.slane %v340_v32, 2  ;;  %v713_v39 = vrot.slane %v342_v37, 1  ;;  %v343_v40 = vld [vmem:[%s2771_s19 + $0x78] sm:$0xff]  ;;  %v348_v44 = vld [vmem:[#allocation5 + $0x20] sm:$0xff]  ;;  %v349_v45 = vld [vmem:[#allocation5 + $0x28] sm:$0xff]  ;;  %v793_v6 = vlaneseq  ;;  %s1806_s22 = sshll.u32 %s326_s23, 4  ;;  %s3100_s22 = int_to_ptr.vmem [resolvable:$true] %s1806_s22 }
  0x71   : > { %2237 = vmatprep.subr.bf16.mxu0 %v2541_v11  ;;  %v706_v34 = vsel %vm705_vm4, %v704_v29, %v703_v30  ;;  %v2229_v46 = vpack.c.bf16 %v349_v45, %v348_v44  ;;  %v350_v47 = vld [vmem:[#allocation5 + $0x30] sm:$0xff]  ;;  %v351_v48 = vld [vmem:[#allocation5 + $0x38] sm:$0xff]  ;;  %v894_v50 = vld [vmem:[%s3147_s5] sm:$0xff]  ;;  %s1793_s9 = scalar_lea.sflag [#allocation4], %s2767_s20  ;;  %s2464_s29 = scalar_lea.vmem %s3100_s22, 128 }
  0x72   : > { %v709_v38 = vsel %vm708_vm5, %v707_v33, %v706_v34  ;;  %v2233_v49 = vpack.c.bf16 %v351_v48, %v350_v47  ;;  %v895_v51 = vld [vmem:[%s3147_s5 + $0x8] sm:$0xff]  ;;  %v896_v53 = vld [vmem:[%s3147_s5 + $0x10] sm:$0xff]  ;;  %v897_v54 = vld [vmem:[%s3147_s5 + $0x18] sm:$0xff]  ;;  %p2465_p11 = scmp.ne.s32.totalorder %s3100_s22, %s2464_s29  ;;  %p3165_p0 = scmp.ne.s32.totalorder %s3159_s16, 0 }
  0x73   : > { %2081 = vmatmul.mubr.msk.f32.vlgmr.msra.gmra.mrb[0].mxu0 %vm352_vm0, %v2791_v9  ;;  %v712_v41 = vsel %vm711_vm6, %v710_v36, %v709_v38  ;;  %2230 = vmatprep.subr.bf16.mxu1 %v2229_v46  ;;  %v2243_v52 = vpack.c.bf16 %v895_v51, %v894_v50  ;;  %v2247_v55 = vpack.c.bf16 %v897_v54, %v896_v53  ;;  %s2545_s28 = smov [#allocation8]  }
  0x74   : > { %2239 = vmatpush3.bf16.msra.mxu0 %v2238_v10  ;;  %2083 = vmatprep.mubr.msk.f32.mxu0 %vm352_vm0, %v2795_v12  ;;  %v715_v43 = vsel %vm714_vm7, %v713_v39, %v712_v41  ;;  %v794_v10 = vshrl.u32 %v793_v6, 7  ;;  %p2466_p2 = pnand %p2465_p11, %p3165_p0  ;;  %s2468_s11 = sshll.u32 %s2545_s28, 4  ;;  %s2469_s11 = int_to_ptr.vmem [resolvable:$false] %s2468_s11 }
  0x75   : > { %2240 = vmatprep.subr.bf16.mxu0 %v2541_v11  ;;  %2232 = vmatpush3.bf16.msra.mxu1 %v2229_v46  ;;  %s2470_s10 = scalar_lea.vmem %s2469_s11, 256  ;;  %p2471_p7 = scmp.lt.s32.totalorder %s3100_s22, %s2469_s11 }
  0x76   : > { %2234 = vmatprep.subr.bf16.mxu1 %v2233_v49  ;;  %p2467_p3 = pneg %p2466_p2  ;;  %p2472_p9 = scmp.lt.s32.totalorder %s2470_s10, %s2464_s29 }
  0x77   : > { %2084 = vmatmul.mubr.msk.f32.gmra.mrb[2].mxu0 %vm352_vm0, %v2808_v15 }
  0x78   : > { %2086 = vmatprep.mubr.msk.f32.mxu0 %vm352_vm0, %v2811_v17  ;;  %2242 = vmatpush3.bf16.msra.mxu0 %v2241_v16  ;;  %p2473_p12 = por %p2472_p9, %p2471_p7 }
  0x79   : > { %2236 = vmatpush3.bf16.msra.mxu1 %v2233_v49 }
  0x7a   : > { %2244 = vmatprep.subr.bf16.mxu1 %v2243_v52  ;;  %p2474_p1 = pnand %p2473_p12, %p2467_p3 }
  0x7b   : > { %2087 = vmatmul.mubr.msk.f32.gmra.mrb[4].mxu0 %vm352_vm0, %v2819_v18 }
  0x7c   : > { %2089 = vmatprep.mubr.msk.f32.mxu0 %vm352_vm0, %v2822_v19  ;;  %2113 = vmatmul.mubr.msk.f32.vlgmr.msra.gmra.mrb[0].mxu1 %vm352_vm0, %v2791_v9  ;;  %v792_v9 = vunpack.c.0.s8 %v791_v5 }
  0x7d   : > { %2115 = vmatprep.mubr.msk.f32.mxu1 %vm352_vm0, %v2795_v12  ;;  %2246 = vmatpush3.bf16.msra.mxu1 %v2243_v52 }
  0x7e   : > { %2248 = vmatprep.subr.bf16.mxu1 %v2247_v55  ;;  %v795_v14 = vsub.s32 %v792_v9, %v794_v10 }
  0x7f   : > { %2090 = vmatmul.mubr.msk.f32.gmra.mrb[6].mxu0 %vm352_vm0, %v335_v21 }
  0x80   : > { %2092 = vmatprep.mubr.msk.f32.mxu0 %vm352_vm0, %v336_v23  ;;  %2116 = vmatmul.mubr.msk.f32.gmra.mrb[2].mxu1 %vm352_vm0, %v2808_v15 }
  0x81   : > { %2118 = vmatprep.mubr.msk.f32.mxu1 %vm352_vm0, %v2811_v17  ;;  %2250 = vmatpush3.bf16.msra.mxu1 %v2247_v55 }
  0x82   : > { %2205 = vmatprep.subr.mxu1 %v2543_v42 }
  0x83   : > { %2093 = vmatmul.mubr.msk.f32.gmra.mrb[8].mxu0 %vm352_vm0, %v337_v26 }
  0x84   : > { %2095 = vmatprep.mubr.msk.f32.mxu0 %vm352_vm0, %v338_v28  ;;  %2119 = vmatmul.mubr.msk.f32.gmra.mrb[4].mxu1 %vm352_vm0, %v2819_v18 }
  0x85   : > { %2121 = vmatprep.mubr.msk.f32.mxu1 %vm352_vm0, %v2822_v19  ;;  %v840_v19 = vsub.s32 0, %v794_v10 }
  0x87   : > { %2096 = vmatmul.mubr.msk.f32.gmra.mrb[10].mxu0 %vm352_vm0, %v339_v31 }
  0x88   : > { %2098 = vmatprep.mubr.msk.f32.mxu0 %vm352_vm0, %v340_v32  ;;  %2122 = vmatmul.mubr.msk.f32.gmra.mrb[6].mxu1 %vm352_vm0, %v335_v21 }
  0x89   : > { %2124 = vmatprep.mubr.msk.f32.mxu1 %vm352_vm0, %v336_v23 }
  0x8b   : > { %2099 = vmatmul.mubr.msk.f32.gmra.mrb[12].mxu0 %vm352_vm0, %v341_v35 }
  0x8c   : > { %2101 = vmatprep.mubr.msk.f32.mxu0 %vm352_vm0, %v342_v37  ;;  %2125 = vmatmul.mubr.msk.f32.gmra.mrb[8].mxu1 %vm352_vm0, %v337_v26 }
  0x8d   : > { %2127 = vmatprep.mubr.msk.f32.mxu1 %vm352_vm0, %v338_v28 }
  0x8f   : > { %2102 = vmatmul.mubr.msk.f32.gmra.mrb[14].mxu0 %vm352_vm0, %v343_v40 }
  0x90   : > { %2144 = vmatprep.mubr.msk.f32.mxu0 %vm2542_vm8, %v2543_v42  ;;  %2128 = vmatmul.mubr.msk.f32.gmra.mrb[10].mxu1 %vm352_vm0, %v339_v31 }
  0x91   : > { %2130 = vmatprep.mubr.msk.f32.mxu1 %vm352_vm0, %v340_v32 }
  0x93   : > { %2145 = vmatmul.mubr.msk.f32.vlgmr.msra.gmra.mrb[16].mxu0 %vm352_vm0, %v715_v43 }
  0x94   : > { %2131 = vmatmul.mubr.msk.f32.gmra.mrb[12].mxu1 %vm352_vm0, %v341_v35 }
  0x95   : > { %2133 = vmatprep.mubr.msk.f32.mxu1 %vm352_vm0, %v342_v37 }
  0x98   : > { %2134 = vmatmul.mubr.msk.f32.gmra.mrb[14].mxu1 %vm352_vm0, %v343_v40 }
 0x146   : > { %v2082_v56 = vpop.f32.mrb[0].mxu0 }
 0x147   : > { %v467_v57 = vpop.f32.mrb[1].mxu0 }
 0x14a   : > { %v2085_v58 = vpop.f32.mrb[2].mxu0 }
 0x14b   : > { %v477_v59 = vpop.f32.mrb[3].mxu0 }
 0x14e   : > { %v2088_v60 = vpop.f32.mrb[4].mxu0 }
 0x14f   : > { %v487_v61 = vpop.f32.mrb[5].mxu0 }
 0x152   : > { %v2091_v62 = vpop.f32.mrb[6].mxu0 }
 0x153   : > { %v497_v63 = vpop.f32.mrb[7].mxu0 }
 0x156   : > { %v2094_v0 = vpop.f32.mrb[8].mxu0 }
 0x157   : > { %v507_v1 = vpop.f32.mrb[9].mxu0 }
 0x15a   : > { %v2097_v2 = vpop.f32.mrb[10].mxu0 }
 0x15b   : > { %v517_v3 = vpop.f32.mrb[11].mxu0 }
 0x15e   : > { %v2100_v7 = vpop.f32.mrb[12].mxu0 }
 0x15f   : > { %v527_v8 = vpop.f32.mrb[13].mxu0 }
 0x162   : > { %v2103_v12 = vpop.f32.mrb[14].mxu0 }
 0x163   : > { %v537_v13 = vpop.f32.mrb[15].mxu0 }
 0x166   : > { %v784_v15 = vpop.f32.mrb[16].mxu0 }
 0x167   : > { %v789_v16 = vcombine.high %v784_v15, %v784_v15  ;;  %v796_v17 = vrot.slane %v784_v15, %v795_v14  ;;  %v2146_v18 = vpop.f32.mrb[17].mxu0 }
 0x169   : > { %v803_v20 = vrot.slane %v789_v16, %v795_v14  ;;  %v804_v21 = vcombine.high %v796_v17, %v796_v17  ;;  %v812_v22 = vrot.slane %v796_v17, %v795_v14 }
 0x16b   : > { %v805_v23 = vcombine.high %v803_v20, %v803_v20  ;;  %v819_v24 = vrot.slane %v803_v20, %v795_v14  ;;  %v826_v25 = vrot.slane %v804_v21, %v795_v14  ;;  %v834_v26 = vcombine.high %v812_v22, %v812_v22 }
 0x16c   : > { %v841_v27 = vrot.slane %v812_v22, %v840_v19 }
 0x16d   : > { %v833_v28 = vrot.slane %v805_v23, %v795_v14  ;;  %v835_v29 = vcombine.high %v819_v24, %v819_v24  ;;  %v836_v30 = vcombine.high %v826_v25, %v826_v25  ;;  %v845_v31 = vrot.slane %v826_v25, %v840_v19 }
 0x16e   : > { %v849_v32 = vrot.slane %v834_v26, %v840_v19  ;;  %v857_v33 = vrot.slane %v819_v24, %v840_v19  ;;  %v879_v34 = vmul.f32 %v2082_v56, %v841_v27  ;;  %v878_v35 = vmul.f32 %v841_v27, %v467_v57  ;;  %v2911_v56 = vpop.f32.mrb[0].mxu1 }
 0x16f   : > { %v837_v36 = vcombine.high %v833_v28, %v833_v28  ;;  %v880_v37 = vmul.f32 %v845_v31, %v477_v59  ;;  %v881_v38 = vmul.f32 %v2085_v58, %v845_v31  ;;  %v853_v39 = vrot.slane %v836_v30, %v840_v19  ;;  %v2913_v57 = vpop.f32.mrb[1].mxu1 }
 0x170   : > { %2155 = vmatprep.mubr.msk.f32.mxu1 %vm352_vm0, %v878_v35  ;;  %v882_v40 = vmul.f32 %v849_v32, %v487_v61  ;;  %v883_v41 = vmul.f32 %v2088_v60, %v849_v32  ;;  %v886_v43 = vmul.f32 %v857_v33, %v507_v1  ;;  %v887_v44 = vmul.f32 %v2094_v0, %v857_v33  ;;  %v2915_v58 = vpop.f32.mrb[2].mxu1 }
 0x171   : > { %2156 = vmatmul.mubr.msk.f32.vlgmr.msra.gmra.mrb[16].mxu1 %vm352_vm0, %v879_v34  ;;  %v884_v45 = vmul.f32 %v853_v39, %v497_v63  ;;  %v885_v46 = vmul.f32 %v2091_v62, %v853_v39  ;;  %v861_v47 = vrot.slane %v833_v28, %v840_v19  ;;  %v865_v48 = vrot.slane %v835_v29, %v840_v19  ;;  %v2917_v59 = vpop.f32.mrb[3].mxu1 }
 0x172   : > { %2158 = vmatprep.mubr.msk.f32.mxu1 %vm352_vm0, %v880_v37  ;;  %v869_v49 = vrot.slane %v837_v36, %v840_v19  ;;  %v2919_v60 = vpop.f32.mrb[4].mxu1 }
 0x173   : > { %v888_v50 = vmul.f32 %v861_v47, %v517_v3  ;;  %v889_v51 = vmul.f32 %v2097_v2, %v861_v47  ;;  %v890_v52 = vmul.f32 %v865_v48, %v527_v8  ;;  %v891_v53 = vmul.f32 %v2100_v7, %v865_v48  ;;  %v2921_v61 = vpop.f32.mrb[5].mxu1  ;;  %v1292_v8 = vld [vmem:[%s3148_s6] sm:$0xff] }
 0x174   : > { %v892_v54 = vmul.f32 %v869_v49, %v537_v13  ;;  %v893_v55 = vmul.f32 %v2103_v12, %v869_v49  ;;  %v2923_v62 = vpop.f32.mrb[6].mxu1  ;;  %2179 = vmatprep.subr.mxu0 %v1292_v8  ;;  %2206 = vmatpush3.msra.mxu1 %v1292_v8 }
 0x175   : > { %2159 = vmatmul.mubr.msk.f32.gmra.mrb[18].mxu1 %vm352_vm0, %v881_v38  ;;  %v2925_v63 = vpop.f32.mrb[7].mxu1  ;;  %2180 = vmatpush3.msra.mxu0 %v1292_v8 }
 0x176   : > { %2161 = vmatprep.mubr.msk.f32.mxu1 %vm352_vm0, %v882_v40  ;;  %v2927_v0 = vpop.f32.mrb[8].mxu1  ;;  %2251 = vmatprep.subr.bf16.mxu0 %v2541_v11 }
 0x177   : > { %v2929_v1 = vpop.f32.mrb[9].mxu1 }
 0x178   : > { %v2931_v2 = vpop.f32.mrb[10].mxu1 }
 0x179   : > { %2162 = vmatmul.mubr.msk.f32.gmra.mrb[20].mxu1 %vm352_vm0, %v883_v41  ;;  %v2933_v3 = vpop.f32.mrb[11].mxu1 }
 0x17a   : > { %2164 = vmatprep.mubr.msk.f32.mxu1 %vm352_vm0, %v884_v45  ;;  %v2935_v4 = vpop.f32.mrb[12].mxu1 }
 0x17b   : > { %v2937_v5 = vpop.f32.mrb[13].mxu1 }
 0x17c   : > { %v2939_v6 = vpop.f32.mrb[14].mxu1 }
 0x17d   : > { %2165 = vmatmul.mubr.msk.f32.gmra.mrb[22].mxu1 %vm352_vm0, %v885_v46  ;;  %v2941_v7 = vpop.f32.mrb[15].mxu1 }
 0x17e   : > { %2167 = vmatprep.mubr.msk.f32.mxu1 %vm352_vm0, %v886_v43 }
 0x181   : > { %2168 = vmatmul.mubr.msk.f32.gmra.mrb[24].mxu1 %vm352_vm0, %v887_v44 }
 0x182   : > { %2170 = vmatprep.mubr.msk.f32.mxu1 %vm352_vm0, %v888_v50 }
 0x185   : > { %2171 = vmatmul.mubr.msk.f32.gmra.mrb[26].mxu1 %vm352_vm0, %v889_v51 }
 0x186   : > { %2173 = vmatprep.mubr.msk.f32.mxu1 %vm352_vm0, %v890_v52 }
 0x189   : > { %2174 = vmatmul.mubr.msk.f32.gmra.mrb[28].mxu1 %vm352_vm0, %v891_v53 }
 0x18a   : > { %2176 = vmatprep.mubr.msk.f32.mxu1 %vm352_vm0, %v892_v54 }
 0x18d   : > { %2177 = vmatmul.mubr.msk.f32.gmra.mrb[30].mxu1 %vm352_vm0, %v893_v55 }
 0x18e   : > { %2207 = vmatprep.mubr.msk.f32.mxu1 %vm2542_vm8, %v2543_v42 }
 0x244   : > { %v2157_v9 = vpop.f32.mrb[16].mxu1 }
 0x245   : > { %v1093_v10 = vsel %vm1091_vm9, %v2157_v9, -inf  ;;  %v1012_v12 = vpop.f32.mrb[17].mxu1 }
 0x246   : > { %v1092_v13 = vsel %vm1091_vm9, %v1012_v12, -inf }
 0x247   : > { %v1094_v14 = vmax.f32 %v1092_v13, %v1093_v10 }
 0x248   : > { %v2160_v15 = vpop.f32.mrb[18].mxu1 }
 0x249   : > { %v1095_v16 = vrot.slane %v1094_v14, 4  ;;  %v1102_v17 = vsel %vm1091_vm9, %v2160_v15, -inf  ;;  %v1022_v18 = vpop.f32.mrb[19].mxu1 }
 0x24a   : > { %v1101_v19 = vsel %vm1091_vm9, %v1022_v18, -inf }
 0x24b   : > { %v1096_v20 = vmax.f32 %v1094_v14, %v1095_v16  ;;  %v1103_v21 = vmax.f32 %v1101_v19, %v1102_v17 }
 0x24c   : > { %v2951_v22 = vpop.f32.mrb[20].mxu1 }
 0x24d   : > { %v1097_v23 = vrot.slane %v1096_v20, 2  ;;  %v1104_v24 = vrot.slane %v1103_v21, 4  ;;  %v1111_v25 = vsel %vm1091_vm9, %v2951_v22, -inf  ;;  %v1032_v26 = vpop.f32.mrb[21].mxu1 }
 0x24e   : > { %v1110_v27 = vsel %vm1091_vm9, %v1032_v26, -inf }
 0x24f   : > { %v1098_v28 = vmax.f32 %v1096_v20, %v1097_v23  ;;  %v1105_v29 = vmax.f32 %v1103_v21, %v1104_v24  ;;  %v1112_v30 = vmax.f32 %v1110_v27, %v1111_v25 }
 0x250   : > { %v2956_v31 = vpop.f32.mrb[22].mxu1 }
 0x251   : > { %v1099_v32 = vrot.slane %v1098_v28, 1  ;;  %v1106_v33 = vrot.slane %v1105_v29, 2  ;;  %v1113_v34 = vrot.slane %v1112_v30, 4  ;;  %v1120_v35 = vsel %vm1091_vm9, %v2956_v31, -inf  ;;  %v2960_v36 = vpop.f32.mrb[23].mxu1 }
 0x252   : > { %v1119_v37 = vsel %vm1091_vm9, %v2960_v36, -inf }
 0x253   : > { %v1100_v38 = vmax.f32 %v1098_v28, %v1099_v32  ;;  %v1107_v39 = vmax.f32 %v1105_v29, %v1106_v33  ;;  %v1114_v40 = vmax.f32 %v1112_v30, %v1113_v34  ;;  %v1121_v41 = vmax.f32 %v1119_v37, %v1120_v35 }
 0x254   : > { %v2964_v43 = vpop.f32.mrb[24].mxu1 }
 0x255   : > { %v1164_v44 = vsub.f32 %v1012_v12, %v1100_v38  ;;  %v1165_v45 = vsub.f32 %v2157_v9, %v1100_v38  ;;  %v1108_v46 = vrot.slane %v1107_v39, 1  ;;  %v1115_v47 = vrot.slane %v1114_v40, 2  ;;  %v2966_v48 = vpop.f32.mrb[25].mxu1 }
 0x256   : > { %v1122_v49 = vrot.slane %v1121_v41, 4  ;;  %v1129_v50 = vsel %vm1091_vm9, %v2964_v43, -inf  ;;  %v1128_v51 = vsel %vm1091_vm9, %v2966_v48, -inf }
 0x257   : > { %v1180_v52 = vmul.f32 1.442695, %v1164_v44  ;;  %v1182_v53 = vmul.f32 1.442695, %v1165_v45  ;;  %v1109_v54 = vmax.f32 %v1107_v39, %v1108_v46  ;;  %v1116_v55 = vmax.f32 %v1114_v40, %v1115_v47 }
 0x258   : > { %v1123_v8 = vmax.f32 %v1121_v41, %v1122_v49  ;;  %v1130_v10 = vmax.f32 %v1128_v51, %v1129_v50  ;;  %v2972_v13 = vpop.f32.mrb[26].mxu1 }
 0x259   : > { %2330 = vpow2.f32 %v1180_v52  ;;  %v1166_v9 = vsub.f32 %v1022_v18, %v1109_v54  ;;  %v1167_v12 = vsub.f32 %v2160_v15, %v1109_v54  ;;  %v1117_v14 = vrot.slane %v1116_v55, 1  ;;  %v2974_v16 = vpop.f32.mrb[27].mxu1 }
 0x25a   : > { %2332 = vpow2.f32 %v1182_v53  ;;  %v1124_v17 = vrot.slane %v1123_v8, 2  ;;  %v1131_v19 = vrot.slane %v1130_v10, 4  ;;  %v1138_v20 = vsel %vm1091_vm9, %v2972_v13, -inf }
 0x25b   : > { %v1184_v21 = vmul.f32 1.442695, %v1166_v9  ;;  %v1186_v23 = vmul.f32 1.442695, %v1167_v12  ;;  %v1118_v24 = vmax.f32 %v1116_v55, %v1117_v14  ;;  %v1137_v25 = vsel %vm1091_vm9, %v2974_v16, -inf }
 0x25c   : > { %v1125_v27 = vmax.f32 %v1123_v8, %v1124_v17  ;;  %v1132_v28 = vmax.f32 %v1130_v10, %v1131_v19  ;;  %v1139_v29 = vmax.f32 %v1137_v25, %v1138_v20  ;;  %v2980_v18 = vpop.f32.mrb[28].mxu1 }
 0x25d   : > { %2334 = vpow2.f32 %v1184_v21  ;;  %v1168_v15 = vsub.f32 %v1032_v26, %v1118_v24  ;;  %v1169_v30 = vsub.f32 %v2951_v22, %v1118_v24  ;;  %v1147_v32 = vsel %vm1091_vm9, %v2980_v18, -inf  ;;  %v2985_v33 = vpop.f32.mrb[29].mxu1 }
 0x25e   : > { %2336 = vpow2.f32 %v1186_v23  ;;  %v1126_v34 = vrot.slane %v1125_v27, 1  ;;  %v1133_v35 = vrot.slane %v1132_v28, 2  ;;  %v1140_v37 = vrot.slane %v1139_v29, 4 }
 0x25f   : > { %v1188_v38 = vmul.f32 1.442695, %v1168_v15  ;;  %v1190_v39 = vmul.f32 1.442695, %v1169_v30  ;;  %v1146_v40 = vsel %vm1091_vm9, %v2985_v33, -inf }
 0x260   : > { %v1127_v41 = vmax.f32 %v1125_v27, %v1126_v34  ;;  %v1134_v44 = vmax.f32 %v1132_v28, %v1133_v35  ;;  %v1141_v45 = vmax.f32 %v1139_v29, %v1140_v37  ;;  %v1148_v26 = vmax.f32 %v1146_v40, %v1147_v32  ;;  %v2989_v46 = vpop.f32.mrb[30].mxu1 }
 0x261   : > { %2338 = vpow2.f32 %v1188_v38  ;;  %v1156_v22 = vsel %vm1091_vm9, %v2989_v46, -inf  ;;  %v2993_v47 = vpop.f32.mrb[31].mxu1 }
 0x262   : > { %2340 = vpow2.f32 %v1190_v39  ;;  %v1170_v49 = vsub.f32 %v2960_v36, %v1127_v41  ;;  %v1171_v50 = vsub.f32 %v2956_v31, %v1127_v41  ;;  %v1135_v51 = vrot.slane %v1134_v44, 1 }
 0x263   : > { %v2331_v52 = vpop.eup %2330  ;;  %v1142_v53 = vrot.slane %v1141_v45, 2  ;;  %v1149_v54 = vrot.slane %v1148_v26, 4  ;;  %v1155_v55 = vsel %vm1091_vm9, %v2993_v47, -inf }
 0x264   : > { %v2333_v8 = vpop.eup %2332  ;;  %v1212_v10 = vsel %vm1091_vm9, %v2331_v52, 0.0  ;;  %v1192_v9 = vmul.f32 1.442695, %v1170_v49  ;;  %v1194_v12 = vmul.f32 1.442695, %v1171_v50  ;;  %v1136_v14 = vmax.f32 %v1134_v44, %v1135_v51  ;;  %2181 = vmatprep.mubr.msk.f32.mxu0 %vm1091_vm9, %v2331_v52 }
 0x265   : > { %v1213_v17 = vsel %vm1091_vm9, %v2333_v8, 0.0  ;;  %v1143_v36 = vmax.f32 %v1141_v45, %v1142_v53  ;;  %v1150_v19 = vmax.f32 %v1148_v26, %v1149_v54  ;;  %v1157_v31 = vmax.f32 %v1155_v55, %v1156_v22  ;;  %2182 = vmatmul.mubr.msk.f32.vlgmr.msra.gmra.mrb[18].mxu0 %vm1091_vm9, %v2333_v8 }
 0x266   : > { %v1214_v20 = vadd.f32 %v1213_v17, %v1212_v10  ;;  %2342 = vpow2.f32 %v1192_v9  ;;  %v1172_v21 = vsub.f32 %v2966_v48, %v1136_v14  ;;  %v1173_v23 = vsub.f32 %v2964_v43, %v1136_v14 }
 0x267   : > { %v2335_v24 = vpop.eup %2334  ;;  %2344 = vpow2.f32 %v1194_v12  ;;  %v1144_v25 = vrot.slane %v1143_v36, 1  ;;  %v1151_v27 = vrot.slane %v1150_v19, 2  ;;  %v1158_v28 = vrot.slane %v1157_v31, 4 }
 0x268   : > { %v2337_v29 = vpop.eup %2336  ;;  %v1215_v15 = vrot.slane %v1214_v20, 4  ;;  %v1221_v30 = vsel %vm1091_vm9, %v2335_v24, 0.0  ;;  %v1196_v32 = vmul.f32 1.442695, %v1172_v21  ;;  %v1198_v34 = vmul.f32 1.442695, %v1173_v23  ;;  %2184 = vmatprep.mubr.msk.f32.mxu0 %vm1091_vm9, %v2335_v24 }
 0x269   : > { %v1222_v35 = vsel %vm1091_vm9, %v2337_v29, 0.0  ;;  %v1145_v37 = vmax.f32 %v1143_v36, %v1144_v25  ;;  %v1152_v38 = vmax.f32 %v1150_v19, %v1151_v27  ;;  %v1159_v48 = vmax.f32 %v1157_v31, %v1158_v28  ;;  %2185 = vmatmul.mubr.msk.f32.gmra.mrb[20].mxu0 %vm1091_vm9, %v2337_v29 }
 0x26a   : > { %v1216_v43 = vadd.f32 %v1215_v15, %v1214_v20  ;;  %v1223_v39 = vadd.f32 %v1222_v35, %v1221_v30  ;;  %2346 = vpow2.f32 %v1196_v32 }
 0x26b   : > { %v2339_v40 = vpop.eup %2338  ;;  %2348 = vpow2.f32 %v1198_v34  ;;  %v1174_v41 = vsub.f32 %v2974_v16, %v1145_v37  ;;  %v1175_v44 = vsub.f32 %v2972_v13, %v1145_v37  ;;  %v1153_v45 = vrot.slane %v1152_v38, 1 }
 0x26c   : > { %v2341_v26 = vpop.eup %2340  ;;  %v1217_v22 = vrot.slane %v1216_v43, 2  ;;  %v1224_v49 = vrot.slane %v1223_v39, 4  ;;  %v1230_v50 = vsel %vm1091_vm9, %v2339_v40, 0.0  ;;  %v1160_v51 = vrot.slane %v1159_v48, 2  ;;  %2187 = vmatprep.mubr.msk.f32.mxu0 %vm1091_vm9, %v2339_v40 }
 0x26d   : > { %v1231_v52 = vsel %vm1091_vm9, %v2341_v26, 0.0  ;;  %v1200_v53 = vmul.f32 1.442695, %v1174_v41  ;;  %v1202_v54 = vmul.f32 1.442695, %v1175_v44  ;;  %v1154_v55 = vmax.f32 %v1152_v38, %v1153_v45  ;;  %2188 = vmatmul.mubr.msk.f32.gmra.mrb[22].mxu0 %vm1091_vm9, %v2341_v26 }
 0x26e   : > { %v1218_v8 = vadd.f32 %v1217_v22, %v1216_v43  ;;  %v1225_v16 = vadd.f32 %v1224_v49, %v1223_v39  ;;  %v1232_v10 = vadd.f32 %v1231_v52, %v1230_v50  ;;  %v1161_v13 = vmax.f32 %v1159_v48, %v1160_v51 }
 0x26f   : > { %2350 = vpow2.f32 %v1200_v53  ;;  %v1176_v9 = vsub.f32 %v2985_v33, %v1154_v55  ;;  %v1177_v12 = vsub.f32 %v2980_v18, %v1154_v55 }
 0x270   : > { %v2343_v14 = vpop.eup %2342  ;;  %v1219_v17 = vrot.slane %v1218_v8, 1  ;;  %v1226_v36 = vrot.slane %v1225_v16, 2  ;;  %v1233_v19 = vrot.slane %v1232_v10, 4  ;;  %2352 = vpow2.f32 %v1202_v54 }
 0x271   : > { %v2345_v31 = vpop.eup %2344  ;;  %v1239_v20 = vsel %vm1091_vm9, %v2343_v14, 0.0  ;;  %v1204_v21 = vmul.f32 1.442695, %v1176_v9  ;;  %v1206_v23 = vmul.f32 1.442695, %v1177_v12  ;;  %v1162_v24 = vrot.slane %v1161_v13, 1  ;;  %2190 = vmatprep.mubr.msk.f32.mxu0 %vm1091_vm9, %v2343_v14 }
 0x272   : > { %v1227_v25 = vadd.f32 %v1226_v36, %v1225_v16  ;;  %v1234_v27 = vadd.f32 %v1233_v19, %v1232_v10  ;;  %v1240_v28 = vsel %vm1091_vm9, %v2345_v31, 0.0  ;;  %2191 = vmatmul.mubr.msk.f32.gmra.mrb[24].mxu0 %vm1091_vm9, %v2345_v31  ;;  %v1220_v18 = vadd.f32 %v1219_v17, %v1218_v8 }
 0x273   : > { %v1241_v33 = vadd.f32 %v1240_v28, %v1239_v20  ;;  %2354 = vpow2.f32 %v1204_v21  ;;  %v1163_v29 = vmax.f32 %v1161_v13, %v1162_v24 }
 0x274   : > { %v2347_v15 = vpop.eup %2346  ;;  %v1228_v30 = vrot.slane %v1227_v25, 1  ;;  %v1235_v32 = vrot.slane %v1234_v27, 2  ;;  %2356 = vpow2.f32 %v1206_v23 }
 0x275   : > { %v2349_v34 = vpop.eup %2348  ;;  %v1242_v35 = vrot.slane %v1241_v33, 4  ;;  %v1248_v37 = vsel %vm1091_vm9, %v2347_v15, 0.0  ;;  %v1178_v38 = vsub.f32 %v2993_v47, %v1163_v29  ;;  %2193 = vmatprep.mubr.msk.f32.mxu0 %vm1091_vm9, %v2347_v15  ;;  %v1179_v40 = vsub.f32 %v2989_v46, %v1163_v29 }
 0x276   : > { %v1229_v48 = vadd.f32 %v1228_v30, %v1227_v25  ;;  %v1236_v43 = vadd.f32 %v1235_v32, %v1234_v27  ;;  %v1249_v39 = vsel %vm1091_vm9, %v2349_v34, 0.0  ;;  %2194 = vmatmul.mubr.msk.f32.gmra.mrb[26].mxu0 %vm1091_vm9, %v2349_v34  ;;  %2358 = vrcp.f32 %v1220_v18 }
 0x277   : > { %v1243_v41 = vadd.f32 %v1242_v35, %v1241_v33  ;;  %v1250_v44 = vadd.f32 %v1249_v39, %v1248_v37  ;;  %v1208_v45 = vmul.f32 1.442695, %v1178_v38  ;;  %v1210_v22 = vmul.f32 1.442695, %v1179_v40 }
 0x278   : > { %2360 = vrcp.f32 %v1229_v48  ;;  %v1237_v26 = vrot.slane %v1236_v43, 1 }
 0x279   : > { %v2351_v49 = vpop.eup %2350  ;;  %v1244_v50 = vrot.slane %v1243_v41, 2  ;;  %v1251_v47 = vrot.slane %v1250_v44, 4  ;;  %2362 = vpow2.f32 %v1208_v45 }
 0x27a   : > { %v2353_v51 = vpop.eup %2352  ;;  %v1238_v52 = vadd.f32 %v1237_v26, %v1236_v43  ;;  %v1257_v53 = vsel %vm1091_vm9, %v2351_v49, 0.0  ;;  %2364 = vpow2.f32 %v1210_v22  ;;  %2196 = vmatprep.mubr.msk.f32.mxu0 %vm1091_vm9, %v2351_v49 }
 0x27b   : > { %v1245_v46 = vadd.f32 %v1244_v50, %v1243_v41  ;;  %v1252_v54 = vadd.f32 %v1251_v47, %v1250_v44  ;;  %v1258_v55 = vsel %vm1091_vm9, %v2353_v51, 0.0  ;;  %2197 = vmatmul.mubr.msk.f32.gmra.mrb[28].mxu0 %vm1091_vm9, %v2353_v51 }
 0x27c   : > { %2366 = vrcp.f32 %v1238_v52  ;;  %v1259_v8 = vadd.f32 %v1258_v55, %v1257_v53 }
 0x27d   : > { %v2355_v16 = vpop.eup %2354  ;;  %v1246_v10 = vrot.slane %v1245_v46, 1  ;;  %v1253_v13 = vrot.slane %v1252_v54, 2 }
 0x27e   : > { %v1260_v9 = vrot.slane %v1259_v8, 4  ;;  %v1266_v12 = vsel %vm1091_vm9, %v2355_v16, 0.0  ;;  %2199 = vmatprep.mubr.msk.f32.mxu0 %vm1091_vm9, %v2355_v16  ;;  %v2357_v14 = vpop.eup %2356 }
 0x27f   : > { %v1247_v17 = vadd.f32 %v1246_v10, %v1245_v46  ;;  %v1254_v36 = vadd.f32 %v1253_v13, %v1252_v54  ;;  %v1267_v31 = vsel %vm1091_vm9, %v2357_v14, 0.0  ;;  %2200 = vmatmul.mubr.msk.f32.gmra.mrb[30].mxu0 %vm1091_vm9, %v2357_v14  ;;  %v1685_v13 = vld [vmem:[#allocation7] sm:$0xff] }
 0x280   : > { %v1261_v19 = vadd.f32 %v1260_v9, %v1259_v8  ;;  %v2359_v20 = vpop.eup %2358  ;;  %v1268_v23 = vadd.f32 %v1267_v31, %v1266_v12  ;;  %v1686_v9 = vld [vmem:[#allocation7 + $0x8] sm:$0xff]  ;;  %v1687_v12 = vld [vmem:[#allocation7 + $0x10] sm:$0xff] }
 0x281   : > { %2368 = vrcp.f32 %v1247_v17  ;;  %v1255_v21 = vrot.slane %v1254_v36, 1  ;;  %v2252_v14 = vpack.c.bf16 %v1686_v9, %v1685_v13  ;;  %v1688_v17 = vld [vmem:[#allocation7 + $0x18] sm:$0xff] }
 0x282   : > { %v2361_v24 = vpop.eup %2360  ;;  %v1262_v25 = vrot.slane %v1261_v19, 2  ;;  %v1269_v18 = vrot.slane %v1268_v23, 4 }
 0x283   : > { %v2363_v27 = vpop.eup %2362  ;;  %v1256_v28 = vadd.f32 %v1255_v21, %v1254_v36  ;;  %v1582_v33 = vsel %vm696_vm1, %v2361_v24, %v2359_v20  ;;  %2253 = vmatpush3.bf16.msra.mxu0 %v2252_v14  ;;  %v2255_v36 = vpack.c.bf16 %v1688_v17, %v1687_v12 }
 0x284   : > { %v2365_v29 = vpop.eup %2364  ;;  %v1263_v15 = vadd.f32 %v1262_v25, %v1261_v19  ;;  %v1275_v30 = vsel %vm1091_vm9, %v2363_v27, 0.0  ;;  %2202 = vmatprep.mubr.msk.f32.mxu0 %vm1091_vm9, %v2363_v27  ;;  %v1270_v32 = vadd.f32 %v1269_v18, %v1268_v23  ;;  %2254 = vmatprep.subr.bf16.mxu0 %v2541_v11 }
 0x285   : > { %2370 = vrcp.f32 %v1256_v28  ;;  %v1276_v34 = vsel %vm1091_vm9, %v2365_v29, 0.0  ;;  %2203 = vmatmul.mubr.msk.f32.gmra.mrb[32].mxu0 %vm1091_vm9, %v2365_v29 }
 0x286   : > { %v2367_v35 = vpop.eup %2366  ;;  %v1264_v37 = vrot.slane %v1263_v15, 1  ;;  %v1277_v38 = vadd.f32 %v1276_v34, %v1275_v30  ;;  %2218 = vmatprep.mubr.msk.f32.mxu0 %vm2542_vm8, %v2543_v42  ;;  %v1271_v48 = vrot.slane %v1270_v32, 2 }
 0x287   : > { %v1583_v43 = vsel %vm699_vm2, %v2367_v35, %v1582_v33  ;;  %2256 = vmatpush3.bf16.msra.mxu0 %v2255_v36 }
 0x288   : > { %v1265_v39 = vadd.f32 %v1264_v37, %v1263_v15  ;;  %v1278_v40 = vrot.slane %v1277_v38, 4  ;;  %v1272_v41 = vadd.f32 %v1271_v48, %v1270_v32 }
 0x28a   : > { %2372 = vrcp.f32 %v1265_v39  ;;  %v1279_v44 = vadd.f32 %v1278_v40, %v1277_v38  ;;  %v1273_v26 = vrot.slane %v1272_v41, 1 }
 0x28b   : > { %v2369_v45 = vpop.eup %2368 }
 0x28c   : > { %v1280_v22 = vrot.slane %v1279_v44, 2  ;;  %v1584_v49 = vsel %vm702_vm3, %v2369_v45, %v1583_v43  ;;  %v1274_v50 = vadd.f32 %v1273_v26, %v1272_v41 }
 0x28e   : > { %v1281_v47 = vadd.f32 %v1280_v22, %v1279_v44  ;;  %2374 = vrcp.f32 %v1274_v50 }
 0x28f   : > { %v2371_v51 = vpop.eup %2370 }
 0x290   : > { %v1282_v52 = vrot.slane %v1281_v47, 1  ;;  %v1585_v42 = vsel %vm705_vm4, %v2371_v51, %v1584_v49 }
 0x292   : > { %v1283_v53 = vadd.f32 %v1282_v52, %v1281_v47 }
 0x294   : > { %v2373_v46 = vpop.eup %2372  ;;  %2376 = vrcp.f32 %v1283_v53 }
 0x295   : > { %v1586_v54 = vsel %vm708_vm5, %v2373_v46, %v1585_v42 }
 0x298   : > { %v2375_v55 = vpop.eup %2374 }
 0x299   : > { %v1587_v8 = vsel %vm711_vm6, %v2375_v55, %v1586_v54 }
 0x29e   : > { %v2377_v16 = vpop.eup %2376 }
 0x29f   : > { %v1588_v10 = vsel %vm714_vm7, %v2377_v16, %v1587_v8 }
 0x2a0   : > { %2208 = vmatmul.mubr.msk.f32.vlgmr.msra.gmra.mrb[32].mxu1 %vm1091_vm9, %v1588_v10 }
 0x338   : > { %v2183_v19 = vpop.f32.mrb[18].mxu0 }
 0x339   : > { %v1487_v31 = vmul.f32 %v2183_v19, %v2911_v56  ;;  %v1407_v20 = vpop.f32.mrb[19].mxu0 }
 0x33a   : > { %v1486_v21 = vmul.f32 %v1407_v20, %v2913_v57 }
 0x33b   : > { %v1503_v23 = vsel %vm352_vm0, %v1487_v31, 0.0 }
 0x33c   : > { %v1502_v24 = vsel %vm352_vm0, %v1486_v21, 0.0  ;;  %v2186_v25 = vpop.f32.mrb[20].mxu0 }
 0x33d   : > { %v1504_v27 = vadd.f32 %v1503_v23, %v1502_v24  ;;  %v1489_v28 = vmul.f32 %v2186_v25, %v2915_v58  ;;  %v1417_v18 = vpop.f32.mrb[21].mxu0 }
 0x33e   : > { %v1488_v33 = vmul.f32 %v1417_v18, %v2917_v59 }
 0x33f   : > { %v1512_v11 = vsel %vm352_vm0, %v1489_v28, 0.0 }
 0x340   : > { %v1511_v29 = vsel %vm352_vm0, %v1488_v33, 0.0  ;;  %v2189_v15 = vpop.f32.mrb[22].mxu0 }
 0x341   : > { %v1513_v56 = vadd.f32 %v1512_v11, %v1511_v29  ;;  %v1491_v30 = vmul.f32 %v2189_v15, %v2919_v60  ;;  %v1427_v57 = vpop.f32.mrb[23].mxu0 }
 0x342   : > { %v1490_v32 = vmul.f32 %v1427_v57, %v2921_v61 }
 0x343   : > { %v1521_v34 = vsel %vm352_vm0, %v1491_v30, 0.0  ;;  %v1514_v12 = vrot.slane %v1513_v56, 4 }
 0x344   : > { %v1520_v35 = vsel %vm352_vm0, %v1490_v32, 0.0 }
 0x345   : > { %v1522_v37 = vadd.f32 %v1521_v34, %v1520_v35  ;;  %v2192_v58 = vpop.f32.mrb[24].mxu0  ;;  %v1515_v21 = vadd.f32 %v1514_v12, %v1513_v56 }
 0x346   : > { %v1493_v38 = vmul.f32 %v2192_v58, %v2923_v62  ;;  %v1437_v59 = vpop.f32.mrb[25].mxu0 }
 0x347   : > { %v1492_v48 = vmul.f32 %v1437_v59, %v2925_v63  ;;  %v1523_v14 = vrot.slane %v1522_v37, 4  ;;  %v1516_v33 = vrot.slane %v1515_v21, 2 }
 0x348   : > { %v1530_v43 = vsel %vm352_vm0, %v1493_v38, 0.0 }
 0x349   : > { %v1529_v39 = vsel %vm352_vm0, %v1492_v48, 0.0  ;;  %v2195_v40 = vpop.f32.mrb[26].mxu0  ;;  %v1524_v23 = vadd.f32 %v1523_v14, %v1522_v37  ;;  %v1517_v35 = vadd.f32 %v1516_v33, %v1515_v21 }
 0x34a   : > { %v1531_v60 = vadd.f32 %v1530_v43, %v1529_v39  ;;  %v1495_v41 = vmul.f32 %v2195_v40, %v2927_v0  ;;  %v1447_v61 = vpop.f32.mrb[27].mxu0 }
 0x34b   : > { %v1494_v44 = vmul.f32 %v1447_v61, %v2929_v1  ;;  %v1525_v11 = vrot.slane %v1524_v23, 2  ;;  %v1518_v43 = vrot.slane %v1517_v35, 1 }
 0x34c   : > { %v1539_v45 = vsel %vm352_vm0, %v1495_v41, 0.0 }
 0x34d   : > { %v1538_v26 = vsel %vm352_vm0, %v1494_v44, 0.0  ;;  %v1526_v58 = vadd.f32 %v1525_v11, %v1524_v23 }
 0x34e   : > { %v1540_v22 = vadd.f32 %v1539_v45, %v1538_v26  ;;  %v2198_v62 = vpop.f32.mrb[28].mxu0  ;;  %v1519_v26 = vadd.f32 %v1518_v43, %v1517_v35 }
 0x34f   : > { %v1497_v49 = vmul.f32 %v2198_v62, %v2931_v2  ;;  %v1457_v63 = vpop.f32.mrb[29].mxu0  ;;  %v1527_v39 = vrot.slane %v1526_v58, 1 }
 0x350   : > { %v1496_v50 = vmul.f32 %v1457_v63, %v2933_v3  ;;  %v1541_v17 = vrot.slane %v1540_v22, 4 }
 0x351   : > { %v1548_v47 = vsel %vm352_vm0, %v1497_v49, 0.0 }
 0x352   : > { %v1547_v51 = vsel %vm352_vm0, %v1496_v50, 0.0  ;;  %v2201_v0 = vpop.f32.mrb[30].mxu0  ;;  %v1542_v24 = vadd.f32 %v1541_v17, %v1540_v22  ;;  %v1528_v22 = vadd.f32 %v1527_v39, %v1526_v58 }
 0x353   : > { %v1549_v52 = vadd.f32 %v1548_v47, %v1547_v51  ;;  %v1499_v42 = vmul.f32 %v2201_v0, %v2935_v4  ;;  %v1467_v1 = vpop.f32.mrb[31].mxu0  ;;  %v1505_v4 = vrot.slane %v1504_v27, 4 }
 0x354   : > { %v1498_v53 = vmul.f32 %v1467_v1, %v2937_v5  ;;  %v1532_v5 = vrot.slane %v1531_v60, 4  ;;  %v1543_v15 = vrot.slane %v1542_v24, 2 }
 0x355   : > { %v1557_v46 = vsel %vm352_vm0, %v1499_v42, 0.0  ;;  %v1550_v36 = vrot.slane %v1549_v52, 4  ;;  %v1506_v20 = vadd.f32 %v1505_v4, %v1504_v27 }
 0x356   : > { %v1556_v54 = vsel %vm352_vm0, %v1498_v53, 0.0  ;;  %v1544_v27 = vadd.f32 %v1543_v15, %v1542_v24 }
 0x357   : > { %v1558_v55 = vadd.f32 %v1557_v46, %v1556_v54  ;;  %v1551_v25 = vadd.f32 %v1550_v36, %v1549_v52  ;;  %v1507_v18 = vrot.slane %v1506_v20, 2 }
 0x358   : > { %v2204_v2 = vpop.f32.mrb[32].mxu0 }
 0x359   : > { %v1501_v8 = vmul.f32 %v2204_v2, %v2939_v6  ;;  %v1477_v3 = vpop.f32.mrb[33].mxu0  ;;  %v1559_v19 = vrot.slane %v1558_v55, 4  ;;  %v1533_v6 = vadd.f32 %v1532_v5, %v1531_v60  ;;  %v1552_v30 = vrot.slane %v1551_v25, 2 }
 0x35a   : > { %v1500_v16 = vmul.f32 %v1477_v3, %v2941_v7  ;;  %v1508_v34 = vadd.f32 %v1507_v18, %v1506_v20  ;;  %v1545_v60 = vrot.slane %v1544_v27, 1 }
 0x35b   : > { %v1566_v10 = vsel %vm352_vm0, %v1501_v8, 0.0  ;;  %v1560_v7 = vadd.f32 %v1559_v19, %v1558_v55  ;;  %v1534_v29 = vrot.slane %v1533_v6, 2  ;;  %v1553_v56 = vadd.f32 %v1552_v30, %v1551_v25 }
 0x35c   : > { %v1565_v13 = vsel %vm352_vm0, %v1500_v16, 0.0  ;;  %v1509_v48 = vrot.slane %v1508_v34, 1  ;;  %v1546_v49 = vadd.f32 %v1545_v60, %v1544_v27 }
 0x35d   : > { %v1567_v9 = vadd.f32 %v1566_v10, %v1565_v13  ;;  %v1561_v57 = vrot.slane %v1560_v7, 2  ;;  %v1535_v38 = vadd.f32 %v1534_v29, %v1533_v6  ;;  %v1554_v41 = vrot.slane %v1553_v56, 1 }
 0x35e   : > { %v1510_v45 = vadd.f32 %v1509_v48, %v1508_v34 }
 0x35f   : > { %v1568_v31 = vrot.slane %v1567_v9, 4  ;;  %v1562_v37 = vadd.f32 %v1561_v57, %v1560_v7  ;;  %v1536_v40 = vrot.slane %v1535_v38, 1  ;;  %v1555_v63 = vadd.f32 %v1554_v41, %v1553_v56 }
 0x361   : > { %v1569_v28 = vadd.f32 %v1568_v31, %v1567_v9  ;;  %v1563_v61 = vrot.slane %v1562_v37, 1  ;;  %v1537_v62 = vadd.f32 %v1536_v40, %v1535_v38 }
 0x363   : > { %v1570_v32 = vrot.slane %v1569_v28, 2  ;;  %v1564_v50 = vadd.f32 %v1563_v61, %v1562_v37 }
 0x365   : > { %v1571_v59 = vadd.f32 %v1570_v32, %v1569_v28  ;;  %v1975_v28 = vld [vmem:[%s3146_s4] ss:$0 sm:$0xff] }
 0x367   : > { %v1572_v44 = vrot.slane %v1571_v59, 1 }
 0x369   : > { %v1573_v47 = vadd.f32 %v1572_v44, %v1571_v59 }
 0x373   : > { %v1657_v51 = vpop.f32.mrb[32].mxu1 }
 0x374   : > { %v1662_v52 = vrot.slane %v1657_v51, 1  ;;  %v1663_v0 = vrot.slane %v1657_v51, 2  ;;  %v1664_v42 = vrot.slane %v1657_v51, 3  ;;  %v1665_v1 = vrot.slane %v1657_v51, 4  ;;  %v2209_v53 = vpop.f32.mrb[33].mxu1 }
 0x375   : > { %v1666_v46 = vrot.slane %v1657_v51, 5  ;;  %v1677_v54 = vmul.f32 %v1657_v51, %v1510_v45  ;;  %v1667_v55 = vrot.slane %v1657_v51, 6  ;;  %v1668_v2 = vrot.slane %v1657_v51, 7 }
 0x376   : > { %v1678_v8 = vmul.f32 %v1662_v52, %v1519_v26  ;;  %v1679_v3 = vmul.f32 %v1663_v0, %v1528_v22  ;;  %v1680_v16 = vmul.f32 %v1664_v42, %v1537_v62  ;;  %v1681_v10 = vmul.f32 %v1665_v1, %v1546_v49 }
 0x377   : > { %v1682_v13 = vmul.f32 %v1666_v46, %v1555_v63  ;;  %v1683_v9 = vmul.f32 %v1667_v55, %v1564_v50  ;;  %v1684_v4 = vmul.f32 %v1668_v2, %v1573_v47 }
 0x378   : > { %v1704_v12 = vrot.slane %v1678_v8, 7  ;;  %v1706_v14 = vrot.slane %v1679_v3, 6  ;;  %v1708_v17 = vrot.slane %v1680_v16, 5  ;;  %v1710_v19 = vrot.slane %v1681_v10, 4 }
 0x379   : > { %v1712_v20 = vrot.slane %v1682_v13, 3  ;;  %v1714_v23 = vrot.slane %v1683_v9, 2  ;;  %v1716_v24 = vrot.slane %v1684_v4, 1 }
 0x37a   : > { %v1705_v5 = vsel %vm696_vm1, %v1704_v12, %v1677_v54 }
 0x37b   : > { %v1707_v36 = vsel %vm699_vm2, %v1706_v14, %v1705_v5 }
 0x37c   : > { %v1709_v31 = vsel %vm702_vm3, %v1708_v17, %v1707_v36 }
 0x37d   : > { %v1711_v21 = vsel %vm705_vm4, %v1710_v19, %v1709_v31 }
 0x37e   : > { %v1713_v6 = vsel %vm708_vm5, %v1712_v20, %v1711_v21 }
 0x37f   : > { %v1715_v25 = vsel %vm711_vm6, %v1714_v23, %v1713_v6 }
 0x380   : > { %v1717_v7 = vsel %vm714_vm7, %v1716_v24, %v1715_v25 }
 0x381   : > { %2219 = vmatmul.mubr.msk.f32.vlgmr.msra.gmra.mrb[34].mxu0 %vm352_vm0, %v1717_v7 }
 0x454   : > { %v1786_v18 = vpop.f32.mrb[34].mxu0 }
 0x455   : > { %v1787_v33 = vadd.f32 %v1975_v28, %v1786_v18  ;;  %v2220_v11 = vpop.f32.mrb[35].mxu0 }
 0x457   : > { %1791 = vst.msk [vmem:[%s326_s23] sm:$0xff] %vm1790_vm10, %v1787_v33 }
 0x458   : > { %2477 = shalt.err (!%p2474_p1)
}
 0x459   : > { %s2478_s20 = scalar_lea.hbm %s3098_s30, 128  ;;  %s2482_s14 = scalar_lea.hbm %s3149_s7, 256 }
 0x45a   : > { %p2479_p13 = scmp.ne.s32.totalorder %s3098_s30, %s2478_s20  ;;  %p2483_p4 = scmp.lt.u32.totalorder %s3098_s30, %s3149_s7 }
 0x45b   : > { %p2484_p5 = scmp.lt.u32.totalorder %s2482_s14, %s2478_s20  ;;  %p2486_p11 = scmp.lt.u32.totalorder %s2478_s20, %s3098_s30 }
 0x45c   : > { %p2480_p6 = pnand %p2479_p13, %p3165_p0 }
 0x45d   : > { %p2485_p8 = por %p2484_p5, %p2483_p4 }
 0x45e   : > { %p2481_p10 = pneg %p2480_p6 }
 0x45f   : > { %p2487_p2 = por %p2486_p11, %p2485_p8 }
 0x461   : > { %p2488_p3 = pnand %p2487_p2, %p2481_p10 }
 0x463   : > { %2491 = shalt.err (!%p2488_p3)
}
 0x464   : > { %2267 = dma.vmem_to_hbm [thread:$0]  (%p3165_p0), %s3100_s22, 128, %s3098_s30, %s1793_s9  }
 0x465 PF: > { %s1818_s18 = sand.u32 1, %s2522_s24   ;;  %p3166_p7 = scmp.ne.s32.totalorder %s3155_s8, 0 }
 0x466   : > { %p3167_p9 = scmp.ge.s32.totalorder %s2534_s27, 2  ;;  %s1819_s19 = scalar_lea.sflag [#allocation4], %s1818_s18 }
 0x468   : > { %p2281_p12 = pnand %p3167_p9, %p3166_p7 }
 0x46a   : > { %2517 = dma.done.wait (!%p2281_p12), %s1819_s19, 128  }
 0x46b   : > { %2519 = vsyncadd (!%p2281_p12), %s1819_s19, 4294967168  ;;  %p21_p1 = scmp.ge.s32.totalorder %s2702_s12, 4   ;;  %s3168_s24 = smov %s2526_s25 }
 0x46c   : > { %s3169_s25 = smov %s2530_s26  ;;  %s3170_s26 = smov %s2718_s17 }
 0x46d   : > { %s3171_s27 = smov %s2702_s12  ;;  %23 = sbr.rel (!%p21_p1) target bundleno = 6 (0x6), region = 101 }
 0x474   :  { %1824 = vsyncpa [#allocation3], 1 }
 0x475   :  { %1826 = vsyncpa [#allocation3 + $0x1], 1 }
 0x476   :  { %1827 = vsyncpa [#allocation6], 1 }
 0x477   :  { %1828 = vsyncpa [#allocation4], 1 }
 0x478   :  { %1830 = vsyncpa [#allocation4 + $0x1], 1 }

</bundles_post_ra>
